<compile_context>
chip_gen: v6e
topology: v6e:2x2x1
jax: 0.10.0
libtpu: 0.0.40
codegen_flags: <defaults>
</compile_context>

<pallas_src>
import jax
import jax.numpy as jnp
from jax.experimental import pallas as pl
from jax.experimental.pallas import tpu as pltpu


def _make_decode_kernel(T, T_pad, H):
    """Builds the un-gridded decode kernel for a fixed (static) sequence length."""

    def kernel(tok_ref,            # (T_pad,) int32  SMEM  token ids (pad = 0)
               emb_ref,            # (O, H)   f32    VMEM  relu(embedding) table
               h0_ref,             # (1, H)   f32    VMEM  initial hidden
               w_ih_ref,           # (H, 3H)  bf16   fused gate weights [r|z|n]
               w_hh_ref,           # (H, 3H)  bf16
               b_rz_ref,           # (1, 2H)  f32    merged r/z biases
               b_in_ref,           # (1, H)   f32    n-gate input bias
               b_hn_ref,           # (1, H)   f32    n-gate hidden bias
               w_out_ref,          # (H, O)   bf16   output projection
               b_out_ref,          # (1, O)   f32
               logp_ref,           # (T_pad, O) f32  OUT   per-step log-probs
               h_out_ref,          # (1, H)     f32  OUT   final hidden
               x_scr,              # (T_pad, H) bf16 VMEM  gathered relu(emb) rows
               hs_scr):            # (T_pad, H) f32  VMEM  per-step hidden states
        # ---- in-kernel embedding gather (token ids read from SMEM) --------------
        for t in range(T_pad):
            row = emb_ref[pl.ds(tok_ref[t], 1), :]                 # (1, H) f32
            x_scr[pl.ds(t, 1), :] = row.astype(jnp.bfloat16)

        # ---- input projection hoisted off the recurrence: one (T_pad, 3H) matmul
        gi_all = jnp.dot(x_scr[...], w_ih_ref[...],
                         preferred_element_type=jnp.float32)       # (T_pad, 3H) f32

        # Hoist weight / bias loads out of the serial loop.
        w_hh = w_hh_ref[...]
        b_rz = b_rz_ref[...]
        b_in = b_in_ref[...]
        b_hn = b_hn_ref[...]

        hs_scr[...] = jnp.zeros_like(hs_scr)   # keep pad rows finite

        # ---- serial GRU recurrence: only the h-dependent matvec is on the path --
        h = h0_ref[...]                                             # (1, H) f32
        for t in range(T):
            gi = gi_all[t:t + 1, :]                                 # (1, 3H) f32
            gh = jnp.dot(h.astype(jnp.bfloat16), w_hh,
                         preferred_element_type=jnp.float32)        # (1, 3H) f32
            rz = gi[:, :2 * H] + gh[:, :2 * H] + b_rz
            r = jax.nn.sigmoid(rz[:, :H])
            z = jax.nn.sigmoid(rz[:, H:])
            # PyTorch GRU: b_hh_n is applied *inside* the r * (...) term.
            n = jnp.tanh(gi[:, 2 * H:] + b_in + r * (gh[:, 2 * H:] + b_hn))
            h = (1.0 - z) * n + z * h
            hs_scr[pl.ds(t, 1), :] = h
        h_out_ref[...] = h

        # ---- deferred batched output projection + log-softmax, one dense store --
        logits = jnp.dot(hs_scr[...].astype(jnp.bfloat16), w_out_ref[...],
                         preferred_element_type=jnp.float32) + b_out_ref[...]
        m = jnp.max(logits, axis=-1, keepdims=True)
        lse = jnp.log(jnp.sum(jnp.exp(logits - m), axis=-1, keepdims=True)) + m
        logp_ref[...] = logits - lse

    return kernel


def gru_decode(tokens, hidden, params):
    """tokens: (T,) int32, hidden: (1, 1, H) f32.
    Returns (log-probs (T, O) f32, final hidden (1, 1, H) f32)."""
    H, O = params["w_out"].shape
    T = int(tokens.shape[0])
    T_pad = ((T + 7) // 8) * 8                       # sublane-dense scratch / output
    h0 = hidden.reshape(1, H).astype(jnp.float32)
    tok = jnp.zeros((T_pad,), jnp.int32).at[:T].set(tokens.astype(jnp.int32))

    vmem = lambda: pl.BlockSpec(memory_space=pltpu.MemorySpace.VMEM)
    smem = lambda: pl.BlockSpec(memory_space=pltpu.MemorySpace.SMEM)

    logp_pad, h_final = pl.pallas_call(
        _make_decode_kernel(T, T_pad, H),
        out_shape=(jax.ShapeDtypeStruct((T_pad, O), jnp.float32),
                   jax.ShapeDtypeStruct((1, H), jnp.float32)),
        in_specs=[smem(),                    # token ids
                  vmem(),                    # relu(embedding) table
                  vmem(),                    # h0
                  vmem(), vmem(),            # w_ih, w_hh (fused [r|z|n])
                  vmem(), vmem(), vmem(),    # b_rz, b_ih_n, b_hh_n
                  vmem(), vmem()],           # w_out, b_out
        out_specs=(vmem(), vmem()),
        scratch_shapes=[pltpu.VMEM((T_pad, H), jnp.bfloat16),
                        pltpu.VMEM((T_pad, H), jnp.float32)],
    )(tok, params["emb_relu"], h0,
      params["w_ih"], params["w_hh"],
      params["b_rz"], params["b_ih_n"], params["b_hh_n"],
      params["w_out"], params["b_out"])

    return logp_pad[:T], h_final.reshape(1, 1, H)


def decoder_step(token, hidden, params):
    """Exact analogue of the PyTorch module's forward(input, hidden): one token."""
    logp, h = gru_decode(jnp.asarray(token, jnp.int32).reshape(1), hidden, params)
    return logp, h          # logp: (1, O), h: (1, 1, H)


def reference_decode(tokens, hidden, p):
    """Pure-JAX reference with identical dtype choices (bf16 matmuls, f32 gate math)."""
    H, O = p["w_out"].shape
    h = hidden.reshape(1, H).astype(jnp.float32)
    logps = []
    for t in range(tokens.shape[0]):
        x = p["emb_relu"][tokens[t]].reshape(1, H).astype(jnp.bfloat16)
        gi = jnp.dot(x, p["w_ih"], preferred_element_type=jnp.float32)
        gh = jnp.dot(h.astype(jnp.bfloat16), p["w_hh"], preferred_element_type=jnp.float32)
        rz = gi[:, :2 * H] + gh[:, :2 * H] + p["b_rz"]
        r = jax.nn.sigmoid(rz[:, :H])
        z = jax.nn.sigmoid(rz[:, H:])
        n = jnp.tanh(gi[:, 2 * H:] + p["b_ih_n"] + r * (gh[:, 2 * H:] + p["b_hh_n"]))
        h = (1.0 - z) * n + z * h
        logits = jnp.dot(h.astype(jnp.bfloat16), p["w_out"],
                         preferred_element_type=jnp.float32) + p["b_out"]
        m = jnp.max(logits, axis=-1, keepdims=True)
        lse = jnp.log(jnp.sum(jnp.exp(logits - m), axis=-1, keepdims=True)) + m
        logps.append(logits - lse)
    return jnp.concatenate(logps, axis=0), h.reshape(1, 1, H)


def init_params(hidden_size, output_size, key):
    H, O = hidden_size, output_size
    ks = jax.random.split(key, 7)
    s = 0.1
    emb = s * jax.random.normal(ks[0], (O, H), jnp.float32)
    b_ih = s * jax.random.normal(ks[3], (3 * H,), jnp.float32)   # gate order [r, z, n]
    b_hh = s * jax.random.normal(ks[4], (3 * H,), jnp.float32)
    return {
        # nn.Embedding(output_size, hidden_size) with F.relu folded into the table
        # (ReLU of a static table is static). Kept f32 so the in-kernel dynamic
        # row gather is sublane-aligned; cast to bf16 at matmul time.
        "emb_relu": jnp.maximum(emb, 0.0),
        # nn.GRU(H, H): torch weight_ih_l0 is (3H, H); stored transposed + gate-fused (H, 3H)
        "w_ih": (s * jax.random.normal(ks[1], (H, 3 * H), jnp.float32)).astype(jnp.bfloat16),
        "w_hh": (s * jax.random.normal(ks[2], (H, 3 * H), jnp.float32)).astype(jnp.bfloat16),
        # merged r/z biases; n-gate biases kept separate (b_hh_n is scaled by r)
        "b_rz": (b_ih[:2 * H] + b_hh[:2 * H]).reshape(1, 2 * H),
        "b_ih_n": b_ih[2 * H:].reshape(1, H),
        "b_hh_n": b_hh[2 * H:].reshape(1, H),
        # nn.Linear(H, O): stored transposed (H, O)
        "w_out": (s * jax.random.normal(ks[5], (H, O), jnp.float32)).astype(jnp.bfloat16),
        "b_out": s * jax.random.normal(ks[6], (1, O), jnp.float32),
    }


if __name__ == "__main__":
    hidden_size = 128    # multiple of 128 -> lane-dense vregs / MXU tiles
    output_size = 256
    T = 8                # decode 8 tokens in ONE un-gridded pallas_call

    params = init_params(hidden_size, output_size, jax.random.PRNGKey(0))
    tokens = jax.random.randint(jax.random.PRNGKey(1), (T,), 0, output_size, dtype=jnp.int32)
    hidden = jnp.zeros((1, 1, hidden_size), jnp.float32)   # initHidden()

    logp, h_final = jax.jit(gru_decode)(tokens, hidden, params)
    jax.block_until_ready((logp, h_final))

    # Shape + normalization sanity.
    assert logp.shape == (T, output_size)
    assert h_final.shape == (1, 1, hidden_size)
    row_sums = jnp.exp(logp).sum(axis=-1)
    assert bool(jnp.all(jnp.abs(row_sums - 1.0) < 1e-3))

    # Numerical check against a pure-JAX reference with identical dtype choices.
    ref_logp, ref_h = reference_decode(tokens, hidden, params)
    assert bool(jnp.allclose(logp, ref_logp, atol=1e-2, rtol=1e-2))
    assert bool(jnp.allclose(h_final, ref_h, atol=1e-2, rtol=1e-2))

    # Single-step call matching the module's forward(input, hidden) signature.
    logp1, h1 = decoder_step(tokens[0], hidden, params)
    jax.block_until_ready((logp1, h1))
    assert logp1.shape == (1, output_size) and h1.shape == (1, 1, hidden_size)
    assert bool(jnp.allclose(logp1, ref_logp[:1], atol=1e-2, rtol=1e-2))

    print("KERNEL_OK")
</pallas_src>

<mosaic_0001>
module attributes {stable_mosaic.version = 11 : i64} {
  func.func @kernel(%arg0: memref<8xi32, #tpu.memory_space<smem>>, %arg1: memref<256x128xf32, #tpu.memory_space<vmem>>, %arg2: memref<1x128xf32, #tpu.memory_space<vmem>>, %arg3: memref<128x384xbf16, #tpu.memory_space<vmem>>, %arg4: memref<128x384xbf16, #tpu.memory_space<vmem>>, %arg5: memref<1x256xf32, #tpu.memory_space<vmem>>, %arg6: memref<1x128xf32, #tpu.memory_space<vmem>>, %arg7: memref<1x128xf32, #tpu.memory_space<vmem>>, %arg8: memref<128x256xbf16, #tpu.memory_space<vmem>>, %arg9: memref<1x256xf32, #tpu.memory_space<vmem>>, %arg10: memref<8x256xf32, #tpu.memory_space<vmem>>, %arg11: memref<1x128xf32, #tpu.memory_space<vmem>>, %arg12: memref<8x128xbf16, #tpu.memory_space<vmem>>, %arg13: memref<8x128xf32, #tpu.memory_space<vmem>>) attributes {dimension_semantics = [], scalar_prefetch = 0 : i64, scratch_operands = 2 : i64, tpu.core_type = #tpu.core_type<tc>} {
    %c0 = arith.constant 0 : index
    %0 = memref.load %arg0[%c0] : memref<8xi32, #tpu.memory_space<smem>>
    %1 = arith.index_cast %0 : i32 to index
    %c0_0 = arith.constant 0 : index
    %2 = vector.load %arg1[%1, %c0_0] : memref<256x128xf32, #tpu.memory_space<vmem>>, vector<1x128xf32>
    %3 = arith.truncf %2 : vector<1x128xf32> to vector<1x128xbf16>
    %c0_1 = arith.constant 0 : index
    %c0_2 = arith.constant 0 : index
    %4 = vector.load %arg12[%c0_1, %c0_2] : memref<8x128xbf16, #tpu.memory_space<vmem>>, vector<1x128xbf16>
    tpu.vector_store %arg12[%c0_1, %c0_2], %3 {strides = array<i32>} : memref<8x128xbf16, #tpu.memory_space<vmem>>, vector<1x128xbf16>,
    %c1 = arith.constant 1 : index
    %5 = memref.load %arg0[%c1] : memref<8xi32, #tpu.memory_space<smem>>
    %6 = arith.index_cast %5 : i32 to index
    %c0_3 = arith.constant 0 : index
    %7 = vector.load %arg1[%6, %c0_3] : memref<256x128xf32, #tpu.memory_space<vmem>>, vector<1x128xf32>
    %8 = arith.truncf %7 : vector<1x128xf32> to vector<1x128xbf16>
    %c1_4 = arith.constant 1 : index
    %c0_5 = arith.constant 0 : index
    %9 = vector.load %arg12[%c1_4, %c0_5] : memref<8x128xbf16, #tpu.memory_space<vmem>>, vector<1x128xbf16>
    tpu.vector_store %arg12[%c1_4, %c0_5], %8 {strides = array<i32>} : memref<8x128xbf16, #tpu.memory_space<vmem>>, vector<1x128xbf16>,
    %c2 = arith.constant 2 : index
    %10 = memref.load %arg0[%c2] : memref<8xi32, #tpu.memory_space<smem>>
    %11 = arith.index_cast %10 : i32 to index
    %c0_6 = arith.constant 0 : index
    %12 = vector.load %arg1[%11, %c0_6] : memref<256x128xf32, #tpu.memory_space<vmem>>, vector<1x128xf32>
    %13 = arith.truncf %12 : vector<1x128xf32> to vector<1x128xbf16>
    %c2_7 = arith.constant 2 : index
    %c0_8 = arith.constant 0 : index
    %14 = vector.load %arg12[%c2_7, %c0_8] : memref<8x128xbf16, #tpu.memory_space<vmem>>, vector<1x128xbf16>
    tpu.vector_store %arg12[%c2_7, %c0_8], %13 {strides = array<i32>} : memref<8x128xbf16, #tpu.memory_space<vmem>>, vector<1x128xbf16>,
    %c3 = arith.constant 3 : index
    %15 = memref.load %arg0[%c3] : memref<8xi32, #tpu.memory_space<smem>>
    %16 = arith.index_cast %15 : i32 to index
    %c0_9 = arith.constant 0 : index
    %17 = vector.load %arg1[%16, %c0_9] : memref<256x128xf32, #tpu.memory_space<vmem>>, vector<1x128xf32>
    %18 = arith.truncf %17 : vector<1x128xf32> to vector<1x128xbf16>
    %c3_10 = arith.constant 3 : index
    %c0_11 = arith.constant 0 : index
    %19 = vector.load %arg12[%c3_10, %c0_11] : memref<8x128xbf16, #tpu.memory_space<vmem>>, vector<1x128xbf16>
    tpu.vector_store %arg12[%c3_10, %c0_11], %18 {strides = array<i32>} : memref<8x128xbf16, #tpu.memory_space<vmem>>, vector<1x128xbf16>,
    %c4 = arith.constant 4 : index
    %20 = memref.load %arg0[%c4] : memref<8xi32, #tpu.memory_space<smem>>
    %21 = arith.index_cast %20 : i32 to index
    %c0_12 = arith.constant 0 : index
    %22 = vector.load %arg1[%21, %c0_12] : memref<256x128xf32, #tpu.memory_space<vmem>>, vector<1x128xf32>
    %23 = arith.truncf %22 : vector<1x128xf32> to vector<1x128xbf16>
    %c4_13 = arith.constant 4 : index
    %c0_14 = arith.constant 0 : index
    %24 = vector.load %arg12[%c4_13, %c0_14] : memref<8x128xbf16, #tpu.memory_space<vmem>>, vector<1x128xbf16>
    tpu.vector_store %arg12[%c4_13, %c0_14], %23 {strides = array<i32>} : memref<8x128xbf16, #tpu.memory_space<vmem>>, vector<1x128xbf16>,
    %c5 = arith.constant 5 : index
    %25 = memref.load %arg0[%c5] : memref<8xi32, #tpu.memory_space<smem>>
    %26 = arith.index_cast %25 : i32 to index
    %c0_15 = arith.constant 0 : index
    %27 = vector.load %arg1[%26, %c0_15] : memref<256x128xf32, #tpu.memory_space<vmem>>, vector<1x128xf32>
    %28 = arith.truncf %27 : vector<1x128xf32> to vector<1x128xbf16>
    %c5_16 = arith.constant 5 : index
    %c0_17 = arith.constant 0 : index
    %29 = vector.load %arg12[%c5_16, %c0_17] : memref<8x128xbf16, #tpu.memory_space<vmem>>, vector<1x128xbf16>
    tpu.vector_store %arg12[%c5_16, %c0_17], %28 {strides = array<i32>} : memref<8x128xbf16, #tpu.memory_space<vmem>>, vector<1x128xbf16>,
    %c6 = arith.constant 6 : index
    %30 = memref.load %arg0[%c6] : memref<8xi32, #tpu.memory_space<smem>>
    %31 = arith.index_cast %30 : i32 to index
    %c0_18 = arith.constant 0 : index
    %32 = vector.load %arg1[%31, %c0_18] : memref<256x128xf32, #tpu.memory_space<vmem>>, vector<1x128xf32>
    %33 = arith.truncf %32 : vector<1x128xf32> to vector<1x128xbf16>
    %c6_19 = arith.constant 6 : index
    %c0_20 = arith.constant 0 : index
    %34 = vector.load %arg12[%c6_19, %c0_20] : memref<8x128xbf16, #tpu.memory_space<vmem>>, vector<1x128xbf16>
    tpu.vector_store %arg12[%c6_19, %c0_20], %33 {strides = array<i32>} : memref<8x128xbf16, #tpu.memory_space<vmem>>, vector<1x128xbf16>,
    %c7 = arith.constant 7 : index
    %35 = memref.load %arg0[%c7] : memref<8xi32, #tpu.memory_space<smem>>
    %36 = arith.index_cast %35 : i32 to index
    %c0_21 = arith.constant 0 : index
    %37 = vector.load %arg1[%36, %c0_21] : memref<256x128xf32, #tpu.memory_space<vmem>>, vector<1x128xf32>
    %38 = arith.truncf %37 : vector<1x128xf32> to vector<1x128xbf16>
    %c7_22 = arith.constant 7 : index
    %c0_23 = arith.constant 0 : index
    %39 = vector.load %arg12[%c7_22, %c0_23] : memref<8x128xbf16, #tpu.memory_space<vmem>>, vector<1x128xbf16>
    tpu.vector_store %arg12[%c7_22, %c0_23], %38 {strides = array<i32>} : memref<8x128xbf16, #tpu.memory_space<vmem>>, vector<1x128xbf16>,
    %c0_24 = arith.constant 0 : index
    %c0_25 = arith.constant 0 : index
    %40 = vector.load %arg12[%c0_24, %c0_25] : memref<8x128xbf16, #tpu.memory_space<vmem>>, vector<8x128xbf16>
    %c0_26 = arith.constant 0 : index
    %c0_27 = arith.constant 0 : index
    %41 = vector.load %arg3[%c0_26, %c0_27] : memref<128x384xbf16, #tpu.memory_space<vmem>>, vector<128x384xbf16>
    %cst = arith.constant dense<0.000000e+00> : vector<8x384xf32>
    %42 = tpu.matmul %40, %41, %cst {dimension_numbers = #tpu.dot_dimension_numbers<[1], [0], [0], [1], [0, 0, 1, 1], [], []>} : vector<8x128xbf16>, vector<128x384xbf16>, vector<8x384xf32> -> vector<8x384xf32>
    %c0_28 = arith.constant 0 : index
    %c0_29 = arith.constant 0 : index
    %43 = vector.load %arg4[%c0_28, %c0_29] : memref<128x384xbf16, #tpu.memory_space<vmem>>, vector<128x384xbf16>
    %c0_30 = arith.constant 0 : index
    %c0_31 = arith.constant 0 : index
    %44 = vector.load %arg5[%c0_30, %c0_31] : memref<1x256xf32, #tpu.memory_space<vmem>>, vector<1x256xf32>
    %c0_32 = arith.constant 0 : index
    %c0_33 = arith.constant 0 : index
    %45 = vector.load %arg6[%c0_32, %c0_33] : memref<1x128xf32, #tpu.memory_space<vmem>>, vector<1x128xf32>
    %c0_34 = arith.constant 0 : index
    %c0_35 = arith.constant 0 : index
    %46 = vector.load %arg7[%c0_34, %c0_35] : memref<1x128xf32, #tpu.memory_space<vmem>>, vector<1x128xf32>
    %cst_36 = arith.constant 0.000000e+00 : f32
    %47 = vector.broadcast %cst_36 : f32 to vector<8x128xf32>
    %c0_37 = arith.constant 0 : index
    %c0_38 = arith.constant 0 : index
    %48 = vector.load %arg13[%c0_37, %c0_38] : memref<8x128xf32, #tpu.memory_space<vmem>>, vector<8x128xf32>
    tpu.vector_store %arg13[%c0_37, %c0_38], %47 {strides = array<i32>} : memref<8x128xf32, #tpu.memory_space<vmem>>, vector<8x128xf32>,
    %c0_39 = arith.constant 0 : index
    %c0_40 = arith.constant 0 : index
    %49 = vector.load %arg2[%c0_39, %c0_40] : memref<1x128xf32, #tpu.memory_space<vmem>>, vector<1x128xf32>
    %50 = vector.extract_strided_slice %42 {offsets = [0, 0], sizes = [1, 384], strides = [1, 1]} : vector<8x384xf32> to vector<1x384xf32>
    %51 = arith.truncf %49 : vector<1x128xf32> to vector<1x128xbf16>
    %cst_41 = arith.constant dense<0.000000e+00> : vector<1x384xf32>
    %52 = tpu.matmul %51, %43, %cst_41 {dimension_numbers = #tpu.dot_dimension_numbers<[1], [0], [0], [1], [0, 0, 1, 1], [], []>} : vector<1x128xbf16>, vector<128x384xbf16>, vector<1x384xf32> -> vector<1x384xf32>
    %53 = vector.extract_strided_slice %50 {offsets = [0, 0], sizes = [1, 256], strides = [1, 1]} : vector<1x384xf32> to vector<1x256xf32>
    %54 = vector.extract_strided_slice %52 {offsets = [0, 0], sizes = [1, 256], strides = [1, 1]} : vector<1x384xf32> to vector<1x256xf32>
    %55 = arith.addf %53, %54 : vector<1x256xf32>
    %56 = arith.addf %55, %44 : vector<1x256xf32>
    %57 = vector.extract_strided_slice %56 {offsets = [0, 0], sizes = [1, 128], strides = [1, 1]} : vector<1x256xf32> to vector<1x128xf32>
    %58 = arith.negf %57 : vector<1x128xf32>
    %59 = math.exp %58 : vector<1x128xf32>
    %cst_42 = arith.constant 1.000000e+00 : f32
    %60 = vector.broadcast %cst_42 : f32 to vector<1x128xf32>
    %61 = arith.addf %60, %59 : vector<1x128xf32>
    %62 = arith.divf %60, %61 : vector<1x128xf32>
    %63 = vector.extract_strided_slice %56 {offsets = [0, 128], sizes = [1, 128], strides = [1, 1]} : vector<1x256xf32> to vector<1x128xf32>
    %64 = arith.negf %63 : vector<1x128xf32>
    %65 = math.exp %64 : vector<1x128xf32>
    %cst_43 = arith.constant 1.000000e+00 : f32
    %66 = vector.broadcast %cst_43 : f32 to vector<1x128xf32>
    %67 = arith.addf %66, %65 : vector<1x128xf32>
    %68 = arith.divf %66, %67 : vector<1x128xf32>
    %69 = vector.extract_strided_slice %50 {offsets = [0, 256], sizes = [1, 128], strides = [1, 1]} : vector<1x384xf32> to vector<1x128xf32>
    %70 = arith.addf %69, %45 : vector<1x128xf32>
    %71 = vector.extract_strided_slice %52 {offsets = [0, 256], sizes = [1, 128], strides = [1, 1]} : vector<1x384xf32> to vector<1x128xf32>
    %72 = arith.addf %71, %46 : vector<1x128xf32>
    %73 = arith.mulf %62, %72 : vector<1x128xf32>
    %74 = arith.addf %70, %73 : vector<1x128xf32>
    %75 = math.tanh %74 : vector<1x128xf32>
    %cst_44 = arith.constant 1.000000e+00 : f32
    %76 = vector.broadcast %cst_44 : f32 to vector<1x128xf32>
    %77 = arith.subf %76, %68 : vector<1x128xf32>
    %78 = arith.mulf %77, %75 : vector<1x128xf32>
    %79 = arith.mulf %68, %49 : vector<1x128xf32>
    %80 = arith.addf %78, %79 : vector<1x128xf32>
    %c0_45 = arith.constant 0 : index
    %c0_46 = arith.constant 0 : index
    %81 = vector.load %arg13[%c0_45, %c0_46] : memref<8x128xf32, #tpu.memory_space<vmem>>, vector<1x128xf32>
    tpu.vector_store %arg13[%c0_45, %c0_46], %80 {strides = array<i32>} : memref<8x128xf32, #tpu.memory_space<vmem>>, vector<1x128xf32>,
    %82 = vector.extract_strided_slice %42 {offsets = [1, 0], sizes = [1, 384], strides = [1, 1]} : vector<8x384xf32> to vector<1x384xf32>
    %83 = arith.truncf %80 : vector<1x128xf32> to vector<1x128xbf16>
    %cst_47 = arith.constant dense<0.000000e+00> : vector<1x384xf32>
    %84 = tpu.matmul %83, %43, %cst_47 {dimension_numbers = #tpu.dot_dimension_numbers<[1], [0], [0], [1], [0, 0, 1, 1], [], []>} : vector<1x128xbf16>, vector<128x384xbf16>, vector<1x384xf32> -> vector<1x384xf32>
    %85 = vector.extract_strided_slice %82 {offsets = [0, 0], sizes = [1, 256], strides = [1, 1]} : vector<1x384xf32> to vector<1x256xf32>
    %86 = vector.extract_strided_slice %84 {offsets = [0, 0], sizes = [1, 256], strides = [1, 1]} : vector<1x384xf32> to vector<1x256xf32>
    %87 = arith.addf %85, %86 : vector<1x256xf32>
    %88 = arith.addf %87, %44 : vector<1x256xf32>
    %89 = vector.extract_strided_slice %88 {offsets = [0, 0], sizes = [1, 128], strides = [1, 1]} : vector<1x256xf32> to vector<1x128xf32>
    %90 = arith.negf %89 : vector<1x128xf32>
    %91 = math.exp %90 : vector<1x128xf32>
    %cst_48 = arith.constant 1.000000e+00 : f32
    %92 = vector.broadcast %cst_48 : f32 to vector<1x128xf32>
    %93 = arith.addf %92, %91 : vector<1x128xf32>
    %94 = arith.divf %92, %93 : vector<1x128xf32>
    %95 = vector.extract_strided_slice %88 {offsets = [0, 128], sizes = [1, 128], strides = [1, 1]} : vector<1x256xf32> to vector<1x128xf32>
    %96 = arith.negf %95 : vector<1x128xf32>
    %97 = math.exp %96 : vector<1x128xf32>
    %cst_49 = arith.constant 1.000000e+00 : f32
    %98 = vector.broadcast %cst_49 : f32 to vector<1x128xf32>
    %99 = arith.addf %98, %97 : vector<1x128xf32>
    %100 = arith.divf %98, %99 : vector<1x128xf32>
    %101 = vector.extract_strided_slice %82 {offsets = [0, 256], sizes = [1, 128], strides = [1, 1]} : vector<1x384xf32> to vector<1x128xf32>
    %102 = arith.addf %101, %45 : vector<1x128xf32>
    %103 = vector.extract_strided_slice %84 {offsets = [0, 256], sizes = [1, 128], strides = [1, 1]} : vector<1x384xf32> to vector<1x128xf32>
    %104 = arith.addf %103, %46 : vector<1x128xf32>
    %105 = arith.mulf %94, %104 : vector<1x128xf32>
    %106 = arith.addf %102, %105 : vector<1x128xf32>
    %107 = math.tanh %106 : vector<1x128xf32>
    %cst_50 = arith.constant 1.000000e+00 : f32
    %108 = vector.broadcast %cst_50 : f32 to vector<1x128xf32>
    %109 = arith.subf %108, %100 : vector<1x128xf32>
    %110 = arith.mulf %109, %107 : vector<1x128xf32>
    %111 = arith.mulf %100, %80 : vector<1x128xf32>
    %112 = arith.addf %110, %111 : vector<1x128xf32>
    %c1_51 = arith.constant 1 : index
    %c0_52 = arith.constant 0 : index
    %113 = vector.load %arg13[%c1_51, %c0_52] : memref<8x128xf32, #tpu.memory_space<vmem>>, vector<1x128xf32>
    tpu.vector_store %arg13[%c1_51, %c0_52], %112 {strides = array<i32>} : memref<8x128xf32, #tpu.memory_space<vmem>>, vector<1x128xf32>,
    %114 = vector.extract_strided_slice %42 {offsets = [2, 0], sizes = [1, 384], strides = [1, 1]} : vector<8x384xf32> to vector<1x384xf32>
    %115 = arith.truncf %112 : vector<1x128xf32> to vector<1x128xbf16>
    %cst_53 = arith.constant dense<0.000000e+00> : vector<1x384xf32>
    %116 = tpu.matmul %115, %43, %cst_53 {dimension_numbers = #tpu.dot_dimension_numbers<[1], [0], [0], [1], [0, 0, 1, 1], [], []>} : vector<1x128xbf16>, vector<128x384xbf16>, vector<1x384xf32> -> vector<1x384xf32>
    %117 = vector.extract_strided_slice %114 {offsets = [0, 0], sizes = [1, 256], strides = [1, 1]} : vector<1x384xf32> to vector<1x256xf32>
    %118 = vector.extract_strided_slice %116 {offsets = [0, 0], sizes = [1, 256], strides = [1, 1]} : vector<1x384xf32> to vector<1x256xf32>
    %119 = arith.addf %117, %118 : vector<1x256xf32>
    %120 = arith.addf %119, %44 : vector<1x256xf32>
    %121 = vector.extract_strided_slice %120 {offsets = [0, 0], sizes = [1, 128], strides = [1, 1]} : vector<1x256xf32> to vector<1x128xf32>
    %122 = arith.negf %121 : vector<1x128xf32>
    %123 = math.exp %122 : vector<1x128xf32>
    %cst_54 = arith.constant 1.000000e+00 : f32
    %124 = vector.broadcast %cst_54 : f32 to vector<1x128xf32>
    %125 = arith.addf %124, %123 : vector<1x128xf32>
    %126 = arith.divf %124, %125 : vector<1x128xf32>
    %127 = vector.extract_strided_slice %120 {offsets = [0, 128], sizes = [1, 128], strides = [1, 1]} : vector<1x256xf32> to vector<1x128xf32>
    %128 = arith.negf %127 : vector<1x128xf32>
    %129 = math.exp %128 : vector<1x128xf32>
    %cst_55 = arith.constant 1.000000e+00 : f32
    %130 = vector.broadcast %cst_55 : f32 to vector<1x128xf32>
    %131 = arith.addf %130, %129 : vector<1x128xf32>
    %132 = arith.divf %130, %131 : vector<1x128xf32>
    %133 = vector.extract_strided_slice %114 {offsets = [0, 256], sizes = [1, 128], strides = [1, 1]} : vector<1x384xf32> to vector<1x128xf32>
    %134 = arith.addf %133, %45 : vector<1x128xf32>
    %135 = vector.extract_strided_slice %116 {offsets = [0, 256], sizes = [1, 128], strides = [1, 1]} : vector<1x384xf32> to vector<1x128xf32>
    %136 = arith.addf %135, %46 : vector<1x128xf32>
    %137 = arith.mulf %126, %136 : vector<1x128xf32>
    %138 = arith.addf %134, %137 : vector<1x128xf32>
    %139 = math.tanh %138 : vector<1x128xf32>
    %cst_56 = arith.constant 1.000000e+00 : f32
    %140 = vector.broadcast %cst_56 : f32 to vector<1x128xf32>
    %141 = arith.subf %140, %132 : vector<1x128xf32>
    %142 = arith.mulf %141, %139 : vector<1x128xf32>
    %143 = arith.mulf %132, %112 : vector<1x128xf32>
    %144 = arith.addf %142, %143 : vector<1x128xf32>
    %c2_57 = arith.constant 2 : index
    %c0_58 = arith.constant 0 : index
    %145 = vector.load %arg13[%c2_57, %c0_58] : memref<8x128xf32, #tpu.memory_space<vmem>>, vector<1x128xf32>
    tpu.vector_store %arg13[%c2_57, %c0_58], %144 {strides = array<i32>} : memref<8x128xf32, #tpu.memory_space<vmem>>, vector<1x128xf32>,
    %146 = vector.extract_strided_slice %42 {offsets = [3, 0], sizes = [1, 384], strides = [1, 1]} : vector<8x384xf32> to vector<1x384xf32>
    %147 = arith.truncf %144 : vector<1x128xf32> to vector<1x128xbf16>
    %cst_59 = arith.constant dense<0.000000e+00> : vector<1x384xf32>
    %148 = tpu.matmul %147, %43, %cst_59 {dimension_numbers = #tpu.dot_dimension_numbers<[1], [0], [0], [1], [0, 0, 1, 1], [], []>} : vector<1x128xbf16>, vector<128x384xbf16>, vector<1x384xf32> -> vector<1x384xf32>
    %149 = vector.extract_strided_slice %146 {offsets = [0, 0], sizes = [1, 256], strides = [1, 1]} : vector<1x384xf32> to vector<1x256xf32>
    %150 = vector.extract_strided_slice %148 {offsets = [0, 0], sizes = [1, 256], strides = [1, 1]} : vector<1x384xf32> to vector<1x256xf32>
    %151 = arith.addf %149, %150 : vector<1x256xf32>
    %152 = arith.addf %151, %44 : vector<1x256xf32>
    %153 = vector.extract_strided_slice %152 {offsets = [0, 0], sizes = [1, 128], strides = [1, 1]} : vector<1x256xf32> to vector<1x128xf32>
    %154 = arith.negf %153 : vector<1x128xf32>
    %155 = math.exp %154 : vector<1x128xf32>
    %cst_60 = arith.constant 1.000000e+00 : f32
    %156 = vector.broadcast %cst_60 : f32 to vector<1x128xf32>
    %157 = arith.addf %156, %155 : vector<1x128xf32>
    %158 = arith.divf %156, %157 : vector<1x128xf32>
    %159 = vector.extract_strided_slice %152 {offsets = [0, 128], sizes = [1, 128], strides = [1, 1]} : vector<1x256xf32> to vector<1x128xf32>
    %160 = arith.negf %159 : vector<1x128xf32>
    %161 = math.exp %160 : vector<1x128xf32>
    %cst_61 = arith.constant 1.000000e+00 : f32
    %162 = vector.broadcast %cst_61 : f32 to vector<1x128xf32>
    %163 = arith.addf %162, %161 : vector<1x128xf32>
    %164 = arith.divf %162, %163 : vector<1x128xf32>
    %165 = vector.extract_strided_slice %146 {offsets = [0, 256], sizes = [1, 128], strides = [1, 1]} : vector<1x384xf32> to vector<1x128xf32>
    %166 = arith.addf %165, %45 : vector<1x128xf32>
    %167 = vector.extract_strided_slice %148 {offsets = [0, 256], sizes = [1, 128], strides = [1, 1]} : vector<1x384xf32> to vector<1x128xf32>
    %168 = arith.addf %167, %46 : vector<1x128xf32>
    %169 = arith.mulf %158, %168 : vector<1x128xf32>
    %170 = arith.addf %166, %169 : vector<1x128xf32>
    %171 = math.tanh %170 : vector<1x128xf32>
    %cst_62 = arith.constant 1.000000e+00 : f32
    %172 = vector.broadcast %cst_62 : f32 to vector<1x128xf32>
    %173 = arith.subf %172, %164 : vector<1x128xf32>
    %174 = arith.mulf %173, %171 : vector<1x128xf32>
    %175 = arith.mulf %164, %144 : vector<1x128xf32>
    %176 = arith.addf %174, %175 : vector<1x128xf32>
    %c3_63 = arith.constant 3 : index
    %c0_64 = arith.constant 0 : index
    %177 = vector.load %arg13[%c3_63, %c0_64] : memref<8x128xf32, #tpu.memory_space<vmem>>, vector<1x128xf32>
    tpu.vector_store %arg13[%c3_63, %c0_64], %176 {strides = array<i32>} : memref<8x128xf32, #tpu.memory_space<vmem>>, vector<1x128xf32>,
    %178 = vector.extract_strided_slice %42 {offsets = [4, 0], sizes = [1, 384], strides = [1, 1]} : vector<8x384xf32> to vector<1x384xf32>
    %179 = arith.truncf %176 : vector<1x128xf32> to vector<1x128xbf16>
    %cst_65 = arith.constant dense<0.000000e+00> : vector<1x384xf32>
    %180 = tpu.matmul %179, %43, %cst_65 {dimension_numbers = #tpu.dot_dimension_numbers<[1], [0], [0], [1], [0, 0, 1, 1], [], []>} : vector<1x128xbf16>, vector<128x384xbf16>, vector<1x384xf32> -> vector<1x384xf32>
    %181 = vector.extract_strided_slice %178 {offsets = [0, 0], sizes = [1, 256], strides = [1, 1]} : vector<1x384xf32> to vector<1x256xf32>
    %182 = vector.extract_strided_slice %180 {offsets = [0, 0], sizes = [1, 256], strides = [1, 1]} : vector<1x384xf32> to vector<1x256xf32>
    %183 = arith.addf %181, %182 : vector<1x256xf32>
    %184 = arith.addf %183, %44 : vector<1x256xf32>
    %185 = vector.extract_strided_slice %184 {offsets = [0, 0], sizes = [1, 128], strides = [1, 1]} : vector<1x256xf32> to vector<1x128xf32>
    %186 = arith.negf %185 : vector<1x128xf32>
    %187 = math.exp %186 : vector<1x128xf32>
    %cst_66 = arith.constant 1.000000e+00 : f32
    %188 = vector.broadcast %cst_66 : f32 to vector<1x128xf32>
    %189 = arith.addf %188, %187 : vector<1x128xf32>
    %190 = arith.divf %188, %189 : vector<1x128xf32>
    %191 = vector.extract_strided_slice %184 {offsets = [0, 128], sizes = [1, 128], strides = [1, 1]} : vector<1x256xf32> to vector<1x128xf32>
    %192 = arith.negf %191 : vector<1x128xf32>
    %193 = math.exp %192 : vector<1x128xf32>
    %cst_67 = arith.constant 1.000000e+00 : f32
    %194 = vector.broadcast %cst_67 : f32 to vector<1x128xf32>
    %195 = arith.addf %194, %193 : vector<1x128xf32>
    %196 = arith.divf %194, %195 : vector<1x128xf32>
    %197 = vector.extract_strided_slice %178 {offsets = [0, 256], sizes = [1, 128], strides = [1, 1]} : vector<1x384xf32> to vector<1x128xf32>
    %198 = arith.addf %197, %45 : vector<1x128xf32>
    %199 = vector.extract_strided_slice %180 {offsets = [0, 256], sizes = [1, 128], strides = [1, 1]} : vector<1x384xf32> to vector<1x128xf32>
    %200 = arith.addf %199, %46 : vector<1x128xf32>
    %201 = arith.mulf %190, %200 : vector<1x128xf32>
    %202 = arith.addf %198, %201 : vector<1x128xf32>
    %203 = math.tanh %202 : vector<1x128xf32>
    %cst_68 = arith.constant 1.000000e+00 : f32
    %204 = vector.broadcast %cst_68 : f32 to vector<1x128xf32>
    %205 = arith.subf %204, %196 : vector<1x128xf32>
    %206 = arith.mulf %205, %203 : vector<1x128xf32>
    %207 = arith.mulf %196, %176 : vector<1x128xf32>
    %208 = arith.addf %206, %207 : vector<1x128xf32>
    %c4_69 = arith.constant 4 : index
    %c0_70 = arith.constant 0 : index
    %209 = vector.load %arg13[%c4_69, %c0_70] : memref<8x128xf32, #tpu.memory_space<vmem>>, vector<1x128xf32>
    tpu.vector_store %arg13[%c4_69, %c0_70], %208 {strides = array<i32>} : memref<8x128xf32, #tpu.memory_space<vmem>>, vector<1x128xf32>,
    %210 = vector.extract_strided_slice %42 {offsets = [5, 0], sizes = [1, 384], strides = [1, 1]} : vector<8x384xf32> to vector<1x384xf32>
    %211 = arith.truncf %208 : vector<1x128xf32> to vector<1x128xbf16>
    %cst_71 = arith.constant dense<0.000000e+00> : vector<1x384xf32>
    %212 = tpu.matmul %211, %43, %cst_71 {dimension_numbers = #tpu.dot_dimension_numbers<[1], [0], [0], [1], [0, 0, 1, 1], [], []>} : vector<1x128xbf16>, vector<128x384xbf16>, vector<1x384xf32> -> vector<1x384xf32>
    %213 = vector.extract_strided_slice %210 {offsets = [0, 0], sizes = [1, 256], strides = [1, 1]} : vector<1x384xf32> to vector<1x256xf32>
    %214 = vector.extract_strided_slice %212 {offsets = [0, 0], sizes = [1, 256], strides = [1, 1]} : vector<1x384xf32> to vector<1x256xf32>
    %215 = arith.addf %213, %214 : vector<1x256xf32>
    %216 = arith.addf %215, %44 : vector<1x256xf32>
    %217 = vector.extract_strided_slice %216 {offsets = [0, 0], sizes = [1, 128], strides = [1, 1]} : vector<1x256xf32> to vector<1x128xf32>
    %218 = arith.negf %217 : vector<1x128xf32>
    %219 = math.exp %218 : vector<1x128xf32>
    %cst_72 = arith.constant 1.000000e+00 : f32
    %220 = vector.broadcast %cst_72 : f32 to vector<1x128xf32>
    %221 = arith.addf %220, %219 : vector<1x128xf32>
    %222 = arith.divf %220, %221 : vector<1x128xf32>
    %223 = vector.extract_strided_slice %216 {offsets = [0, 128], sizes = [1, 128], strides = [1, 1]} : vector<1x256xf32> to vector<1x128xf32>
    %224 = arith.negf %223 : vector<1x128xf32>
    %225 = math.exp %224 : vector<1x128xf32>
    %cst_73 = arith.constant 1.000000e+00 : f32
    %226 = vector.broadcast %cst_73 : f32 to vector<1x128xf32>
    %227 = arith.addf %226, %225 : vector<1x128xf32>
    %228 = arith.divf %226, %227 : vector<1x128xf32>
    %229 = vector.extract_strided_slice %210 {offsets = [0, 256], sizes = [1, 128], strides = [1, 1]} : vector<1x384xf32> to vector<1x128xf32>
    %230 = arith.addf %229, %45 : vector<1x128xf32>
    %231 = vector.extract_strided_slice %212 {offsets = [0, 256], sizes = [1, 128], strides = [1, 1]} : vector<1x384xf32> to vector<1x128xf32>
    %232 = arith.addf %231, %46 : vector<1x128xf32>
    %233 = arith.mulf %222, %232 : vector<1x128xf32>
    %234 = arith.addf %230, %233 : vector<1x128xf32>
    %235 = math.tanh %234 : vector<1x128xf32>
    %cst_74 = arith.constant 1.000000e+00 : f32
    %236 = vector.broadcast %cst_74 : f32 to vector<1x128xf32>
    %237 = arith.subf %236, %228 : vector<1x128xf32>
    %238 = arith.mulf %237, %235 : vector<1x128xf32>
    %239 = arith.mulf %228, %208 : vector<1x128xf32>
    %240 = arith.addf %238, %239 : vector<1x128xf32>
    %c5_75 = arith.constant 5 : index
    %c0_76 = arith.constant 0 : index
    %241 = vector.load %arg13[%c5_75, %c0_76] : memref<8x128xf32, #tpu.memory_space<vmem>>, vector<1x128xf32>
    tpu.vector_store %arg13[%c5_75, %c0_76], %240 {strides = array<i32>} : memref<8x128xf32, #tpu.memory_space<vmem>>, vector<1x128xf32>,
    %242 = vector.extract_strided_slice %42 {offsets = [6, 0], sizes = [1, 384], strides = [1, 1]} : vector<8x384xf32> to vector<1x384xf32>
    %243 = arith.truncf %240 : vector<1x128xf32> to vector<1x128xbf16>
    %cst_77 = arith.constant dense<0.000000e+00> : vector<1x384xf32>
    %244 = tpu.matmul %243, %43, %cst_77 {dimension_numbers = #tpu.dot_dimension_numbers<[1], [0], [0], [1], [0, 0, 1, 1], [], []>} : vector<1x128xbf16>, vector<128x384xbf16>, vector<1x384xf32> -> vector<1x384xf32>
    %245 = vector.extract_strided_slice %242 {offsets = [0, 0], sizes = [1, 256], strides = [1, 1]} : vector<1x384xf32> to vector<1x256xf32>
    %246 = vector.extract_strided_slice %244 {offsets = [0, 0], sizes = [1, 256], strides = [1, 1]} : vector<1x384xf32> to vector<1x256xf32>
    %247 = arith.addf %245, %246 : vector<1x256xf32>
    %248 = arith.addf %247, %44 : vector<1x256xf32>
    %249 = vector.extract_strided_slice %248 {offsets = [0, 0], sizes = [1, 128], strides = [1, 1]} : vector<1x256xf32> to vector<1x128xf32>
    %250 = arith.negf %249 : vector<1x128xf32>
    %251 = math.exp %250 : vector<1x128xf32>
    %cst_78 = arith.constant 1.000000e+00 : f32
    %252 = vector.broadcast %cst_78 : f32 to vector<1x128xf32>
    %253 = arith.addf %252, %251 : vector<1x128xf32>
    %254 = arith.divf %252, %253 : vector<1x128xf32>
    %255 = vector.extract_strided_slice %248 {offsets = [0, 128], sizes = [1, 128], strides = [1, 1]} : vector<1x256xf32> to vector<1x128xf32>
    %256 = arith.negf %255 : vector<1x128xf32>
    %257 = math.exp %256 : vector<1x128xf32>
    %cst_79 = arith.constant 1.000000e+00 : f32
    %258 = vector.broadcast %cst_79 : f32 to vector<1x128xf32>
    %259 = arith.addf %258, %257 : vector<1x128xf32>
    %260 = arith.divf %258, %259 : vector<1x128xf32>
    %261 = vector.extract_strided_slice %242 {offsets = [0, 256], sizes = [1, 128], strides = [1, 1]} : vector<1x384xf32> to vector<1x128xf32>
    %262 = arith.addf %261, %45 : vector<1x128xf32>
    %263 = vector.extract_strided_slice %244 {offsets = [0, 256], sizes = [1, 128], strides = [1, 1]} : vector<1x384xf32> to vector<1x128xf32>
    %264 = arith.addf %263, %46 : vector<1x128xf32>
    %265 = arith.mulf %254, %264 : vector<1x128xf32>
    %266 = arith.addf %262, %265 : vector<1x128xf32>
    %267 = math.tanh %266 : vector<1x128xf32>
    %cst_80 = arith.constant 1.000000e+00 : f32
    %268 = vector.broadcast %cst_80 : f32 to vector<1x128xf32>
    %269 = arith.subf %268, %260 : vector<1x128xf32>
    %270 = arith.mulf %269, %267 : vector<1x128xf32>
    %271 = arith.mulf %260, %240 : vector<1x128xf32>
    %272 = arith.addf %270, %271 : vector<1x128xf32>
    %c6_81 = arith.constant 6 : index
    %c0_82 = arith.constant 0 : index
    %273 = vector.load %arg13[%c6_81, %c0_82] : memref<8x128xf32, #tpu.memory_space<vmem>>, vector<1x128xf32>
    tpu.vector_store %arg13[%c6_81, %c0_82], %272 {strides = array<i32>} : memref<8x128xf32, #tpu.memory_space<vmem>>, vector<1x128xf32>,
    %274 = vector.extract_strided_slice %42 {offsets = [7, 0], sizes = [1, 384], strides = [1, 1]} : vector<8x384xf32> to vector<1x384xf32>
    %275 = arith.truncf %272 : vector<1x128xf32> to vector<1x128xbf16>
    %cst_83 = arith.constant dense<0.000000e+00> : vector<1x384xf32>
    %276 = tpu.matmul %275, %43, %cst_83 {dimension_numbers = #tpu.dot_dimension_numbers<[1], [0], [0], [1], [0, 0, 1, 1], [], []>} : vector<1x128xbf16>, vector<128x384xbf16>, vector<1x384xf32> -> vector<1x384xf32>
    %277 = vector.extract_strided_slice %274 {offsets = [0, 0], sizes = [1, 256], strides = [1, 1]} : vector<1x384xf32> to vector<1x256xf32>
    %278 = vector.extract_strided_slice %276 {offsets = [0, 0], sizes = [1, 256], strides = [1, 1]} : vector<1x384xf32> to vector<1x256xf32>
    %279 = arith.addf %277, %278 : vector<1x256xf32>
    %280 = arith.addf %279, %44 : vector<1x256xf32>
    %281 = vector.extract_strided_slice %280 {offsets = [0, 0], sizes = [1, 128], strides = [1, 1]} : vector<1x256xf32> to vector<1x128xf32>
    %282 = arith.negf %281 : vector<1x128xf32>
    %283 = math.exp %282 : vector<1x128xf32>
    %cst_84 = arith.constant 1.000000e+00 : f32
    %284 = vector.broadcast %cst_84 : f32 to vector<1x128xf32>
    %285 = arith.addf %284, %283 : vector<1x128xf32>
    %286 = arith.divf %284, %285 : vector<1x128xf32>
    %287 = vector.extract_strided_slice %280 {offsets = [0, 128], sizes = [1, 128], strides = [1, 1]} : vector<1x256xf32> to vector<1x128xf32>
    %288 = arith.negf %287 : vector<1x128xf32>
    %289 = math.exp %288 : vector<1x128xf32>
    %cst_85 = arith.constant 1.000000e+00 : f32
    %290 = vector.broadcast %cst_85 : f32 to vector<1x128xf32>
    %291 = arith.addf %290, %289 : vector<1x128xf32>
    %292 = arith.divf %290, %291 : vector<1x128xf32>
    %293 = vector.extract_strided_slice %274 {offsets = [0, 256], sizes = [1, 128], strides = [1, 1]} : vector<1x384xf32> to vector<1x128xf32>
    %294 = arith.addf %293, %45 : vector<1x128xf32>
    %295 = vector.extract_strided_slice %276 {offsets = [0, 256], sizes = [1, 128], strides = [1, 1]} : vector<1x384xf32> to vector<1x128xf32>
    %296 = arith.addf %295, %46 : vector<1x128xf32>
    %297 = arith.mulf %286, %296 : vector<1x128xf32>
    %298 = arith.addf %294, %297 : vector<1x128xf32>
    %299 = math.tanh %298 : vector<1x128xf32>
    %cst_86 = arith.constant 1.000000e+00 : f32
    %300 = vector.broadcast %cst_86 : f32 to vector<1x128xf32>
    %301 = arith.subf %300, %292 : vector<1x128xf32>
    %302 = arith.mulf %301, %299 : vector<1x128xf32>
    %303 = arith.mulf %292, %272 : vector<1x128xf32>
    %304 = arith.addf %302, %303 : vector<1x128xf32>
    %c7_87 = arith.constant 7 : index
    %c0_88 = arith.constant 0 : index
    %305 = vector.load %arg13[%c7_87, %c0_88] : memref<8x128xf32, #tpu.memory_space<vmem>>, vector<1x128xf32>
    tpu.vector_store %arg13[%c7_87, %c0_88], %304 {strides = array<i32>} : memref<8x128xf32, #tpu.memory_space<vmem>>, vector<1x128xf32>,
    %c0_89 = arith.constant 0 : index
    %c0_90 = arith.constant 0 : index
    %306 = vector.load %arg11[%c0_89, %c0_90] : memref<1x128xf32, #tpu.memory_space<vmem>>, vector<1x128xf32>
    tpu.vector_store %arg11[%c0_89, %c0_90], %304 {strides = array<i32>} : memref<1x128xf32, #tpu.memory_space<vmem>>, vector<1x128xf32>,
    %c0_91 = arith.constant 0 : index
    %c0_92 = arith.constant 0 : index
    %307 = vector.load %arg13[%c0_91, %c0_92] : memref<8x128xf32, #tpu.memory_space<vmem>>, vector<8x128xf32>
    %308 = arith.truncf %307 : vector<8x128xf32> to vector<8x128xbf16>
    %c0_93 = arith.constant 0 : index
    %c0_94 = arith.constant 0 : index
    %309 = vector.load %arg8[%c0_93, %c0_94] : memref<128x256xbf16, #tpu.memory_space<vmem>>, vector<128x256xbf16>
    %cst_95 = arith.constant dense<0.000000e+00> : vector<8x256xf32>
    %310 = tpu.matmul %308, %309, %cst_95 {dimension_numbers = #tpu.dot_dimension_numbers<[1], [0], [0], [1], [0, 0, 1, 1], [], []>} : vector<8x128xbf16>, vector<128x256xbf16>, vector<8x256xf32> -> vector<8x256xf32>
    %c0_96 = arith.constant 0 : index
    %c0_97 = arith.constant 0 : index
    %311 = vector.load %arg9[%c0_96, %c0_97] : memref<1x256xf32, #tpu.memory_space<vmem>>, vector<1x256xf32>
    %312 = vector.broadcast %311 : vector<1x256xf32> to vector<8x256xf32>
    %313 = arith.addf %310, %312 : vector<8x256xf32>
    %cst_98 = arith.constant dense<0xFF800000> : vector<8xf32>
    %314 = vector.multi_reduction <maximumf>, %313, %cst_98 [1] : vector<8x256xf32> to vector<8xf32>
    %315 = vector.shape_cast %314 : vector<8xf32> to vector<8x1xf32>
    %316 = vector.broadcast %315 : vector<8x1xf32> to vector<8x256xf32>
    %317 = arith.subf %313, %316 : vector<8x256xf32>
    %318 = math.exp %317 : vector<8x256xf32>
    %cst_99 = arith.constant dense<0.000000e+00> : vector<8xf32>
    %319 = vector.multi_reduction <add>, %318, %cst_99 [1] : vector<8x256xf32> to vector<8xf32>
    %320 = vector.shape_cast %319 : vector<8xf32> to vector<8x1xf32>
    %321 = math.log %320 : vector<8x1xf32>
    %322 = arith.addf %321, %315 : vector<8x1xf32>
    %323 = vector.broadcast %322 : vector<8x1xf32> to vector<8x256xf32>
    %324 = arith.subf %313, %323 : vector<8x256xf32>
    %c0_100 = arith.constant 0 : index
    %c0_101 = arith.constant 0 : index
    %325 = vector.load %arg10[%c0_100, %c0_101] : memref<8x256xf32, #tpu.memory_space<vmem>>, vector<8x256xf32>
    tpu.vector_store %arg10[%c0_100, %c0_101], %324 {strides = array<i32>} : memref<8x256xf32, #tpu.memory_space<vmem>>, vector<8x256xf32>,
    return
  }
}

</mosaic_0001>

<bundles_post_ra>
// kernel: gru_decode.1
= control target key start
LH: loop header
LB: loop body
LE: loop exit
PB: predicated region body
PF: predicated region fallthrough
CT: control target
= control target key end

     0   :  { %17 = vsyncpa [#allocation7], 0  ;;  %s3238_s0 = inlined_call_operand.vmem [shape: s32[8], index: 0, kind: input, shape index: {}]   ;;  %s3239_s1 = inlined_call_operand.hbm [shape: f32[256,128], index: 1, kind: input, shape index: {}]   ;;  %s3240_s2 = inlined_call_operand.hbm [shape: f32[1,128], index: 2, kind: input, shape index: {}]   ;;  %s3241_s3 = inlined_call_operand.hbm [shape: bf16[128,384], index: 3, kind: input, shape index: {}]   ;;  %s3242_s4 = inlined_call_operand.hbm [shape: bf16[128,384], index: 4, kind: input, shape index: {}]   ;;  %s3243_s5 = inlined_call_operand.vmem [shape: f32[1,256], index: 5, kind: input, shape index: {}]   ;;  %s3244_s6 = inlined_call_operand.vmem [shape: f32[1,128], index: 6, kind: input, shape index: {}]   ;;  %s3245_s7 = inlined_call_operand.hbm [shape: f32[1,128], index: 7, kind: input, shape index: {}]   ;;  %s3246_s8 = inlined_call_operand.hbm [shape: bf16[128,256], index: 8, kind: input, shape index: {}]   ;;  %s3247_s9 = inlined_call_operand.vmem [shape: f32[1,256], index: 9, kind: input, shape index: {}]   ;;  %s3248_s10 = inlined_call_operand.hbm [shape: f32[8,256], index: 10, kind: output, shape index: {0}]   ;;  %s3249_s11 = inlined_call_operand.hbm [shape: f32[1,128], index: 11, kind: output, shape index: {1}]  }
   0x1   :  { %18 = vsyncpa [#allocation5], 0 }
   0x2   :  { %19 = vsyncpa [#allocation10], 0 }
   0x3   :  { %20 = vsyncpa [#allocation13], 0 }
   0x4   :  { %21 = vsyncpa [#allocation16], 0 }
   0x5   :  { %22 = vsyncpa [#allocation6], 0 }
   0x6   :  { %23 = vsyncpa [#allocation19], 0  ;;  %s2617_s17 = smov [#allocation9]  }
   0x7   :  { %s52_s18 = sshll.u32 %s2617_s17, 4  ;;  %s53_s18 = int_to_ptr.vmem [resolvable:$true] %s52_s18 }
   0x8   :  { %s2439_s19 = scalar_lea.vmem %s53_s18, 16  ;;  %s2443_s20 = scalar_lea.vmem %s53_s18, 32 }
   0x9   :  { %p2440_p0 = scmp.ne.s32.totalorder %s53_s18, %s2439_s19  ;;  %p2444_p1 = scmp.lt.s32.totalorder %s53_s18, %s53_s18 }
   0xa   :  { %p2445_p2 = scmp.lt.s32.totalorder %s2443_s20, %s2439_s19 }
   0xc   :  { %p2446_p3 = por %p2445_p2, %p2444_p1 }
   0xe   :  { %p2447_p4 = pnand %p2446_p3, %p2440_p0 }
  0x10   :  { %2450 = shalt.err (!%p2447_p4)
}
  0x11   :  { %55 = dma.hbm_to_vmem [thread:$0]  %s3240_s2, 16, %s53_s18, [#allocation10]  }
  0x12   :  { %s2618_s23 = smov [#allocation12]   ;;  %s30_s27 = sshll.u32 %s3238_s0, 4  ;;  %s31_s27 = int_to_ptr.vmem [resolvable:$true] %s30_s27 }
  0x13   :  { %s73_s24 = sshll.u32 %s2618_s23, 4  ;;  %s74_s24 = int_to_ptr.vmem [resolvable:$true] %s73_s24 }
  0x14   :  { %s2459_s28 = scalar_lea.vmem %s74_s24, 3072  ;;  %p2464_p6 = scmp.lt.s32.totalorder %s74_s24, %s74_s24 }
  0x15   :  { %p2460_p5 = scmp.ne.s32.totalorder %s74_s24, %s2459_s28  ;;  %p2465_p7 = scmp.lt.s32.totalorder %s2459_s28, %s2459_s28 }
  0x17   :  { %p2466_p8 = por %p2465_p7, %p2464_p6 }
  0x19   :  { %p2467_p9 = pnand %p2466_p8, %p2460_p5 }
  0x1b   :  { %2470 = shalt.err (!%p2467_p9)
}
  0x1c   :  { %s2619_s29 = smov 192   ;;  %s2620_s30 = smov 12  }
  0x1d   :  { %79 = dma.hbm_to_vmem [thread:$0]  %s3242_s4, 3072, %s74_s24, [#allocation13], %s2619_s29, %s2619_s29, %s2620_s30  }
  0x1e   :  { %s2471_s13 = scalar_lea.vmem %s31_s27, 16  ;;  %p2476_p11 = scmp.lt.s32.totalorder %s31_s27, %s31_s27 }
  0x1f   :  { %p2472_p10 = scmp.ne.s32.totalorder %s31_s27, %s2471_s13  ;;  %p2477_p12 = scmp.lt.s32.totalorder %s2471_s13, %s2471_s13 }
  0x21   :  { %p2478_p13 = por %p2477_p12, %p2476_p11 }
  0x23   :  { %p2479_p0 = pnand %p2478_p13, %p2472_p10 }
  0x25   :  { %2482 = shalt.err (!%p2479_p0)
}
  0x26   :  { %s2621_s0 = smov [#allocation4]   ;;  %s2622_s14 = smov [#allocation8]  }
  0x27   :  { %33 = dma.vmem_to_smem %s31_s27, 16, %s2621_s0, [#allocation7]  }
  0x28   :  { %s39_s15 = sshll.u32 %s2622_s14, 4  ;;  %s40_s15 = int_to_ptr.vmem [resolvable:$true] %s39_s15 }
  0x29   :  { %s2491_s16 = scalar_lea.vmem %s40_s15, 4096  ;;  %p2496_p2 = scmp.lt.s32.totalorder %s40_s15, %s40_s15 }
  0x2a   :  { %p2492_p1 = scmp.ne.s32.totalorder %s40_s15, %s2491_s16  ;;  %p2497_p3 = scmp.lt.s32.totalorder %s2491_s16, %s2491_s16 }
  0x2c   :  { %p2498_p4 = por %p2497_p3, %p2496_p2 }
  0x2e   :  { %p2499_p5 = pnand %p2498_p4, %p2492_p1 }
  0x30   :  { %2502 = shalt.err (!%p2499_p5)
}
  0x31   :  { %s2623_s4 = smov 128   ;;  %s2624_s17 = smov 8  }
  0x32   :  { %45 = dma.hbm_to_vmem [thread:$0]  %s3239_s1, 4096, %s40_s15, [#allocation5], %s2623_s4, %s2623_s4, %s2624_s17  }
  0x33   :  { %s2625_s20 = smov [#allocation11]   ;;  %s2626_s22 = smov [#allocation14]  }
  0x34   :  { %s61_s21 = sshll.u32 %s2625_s20, 4  ;;  %s90_s23 = sshll.u32 %s2626_s22, 4  ;;  %s62_s21 = int_to_ptr.vmem [resolvable:$true] %s61_s21  ;;  %s91_s23 = int_to_ptr.vmem [resolvable:$true] %s90_s23 }
  0x35   :  { %s2511_s24 = scalar_lea.vmem %s62_s21, 3072  ;;  %p2516_p7 = scmp.lt.s32.totalorder %s62_s21, %s62_s21 }
  0x36   :  { %p2512_p6 = scmp.ne.s32.totalorder %s62_s21, %s2511_s24  ;;  %p2517_p8 = scmp.lt.s32.totalorder %s2511_s24, %s2511_s24 }
  0x38   :  { %p2518_p9 = por %p2517_p8, %p2516_p7 }
  0x3a   :  { %p2519_p10 = pnand %p2518_p9, %p2512_p6 }
  0x3c   :  { %2522 = shalt.err (!%p2519_p10)
}
  0x3d   :  { %67 = dma.hbm_to_vmem [thread:$0]  %s3241_s3, 3072, %s62_s21, [#allocation10], %s2619_s29, %s2619_s29, %s2620_s30  }
  0x3e   :  { %s2531_s1 = scalar_lea.vmem %s91_s23, 16  ;;  %s2535_s27 = scalar_lea.vmem %s91_s23, 32 }
  0x3f   :  { %p2532_p11 = scmp.ne.s32.totalorder %s91_s23, %s2531_s1  ;;  %p2536_p12 = scmp.lt.s32.totalorder %s91_s23, %s91_s23 }
  0x40   :  { %p2537_p13 = scmp.lt.s32.totalorder %s2535_s27, %s2531_s1 }
  0x42   :  { %p2538_p0 = por %p2537_p13, %p2536_p12 }
  0x44   :  { %p2539_p1 = pnand %p2538_p0, %p2532_p11 }
  0x46   :  { %2542 = shalt.err (!%p2539_p1)
}
  0x47   :  { %93 = dma.hbm_to_vmem [thread:$0]  %s3245_s7, 16, %s91_s23, [#allocation13]  }
  0x48   :  { %s2627_s12 = smov [#allocation15]  }
  0x49   :  { %s99_s13 = sshll.u32 %s2627_s12, 4  ;;  %s100_s13 = int_to_ptr.vmem [resolvable:$true] %s99_s13 }
  0x4a   :  { %s2551_s0 = scalar_lea.vmem %s100_s13, 2048  ;;  %p2556_p3 = scmp.lt.s32.totalorder %s100_s13, %s100_s13 }
  0x4b   :  { %p2552_p2 = scmp.ne.s32.totalorder %s100_s13, %s2551_s0  ;;  %p2557_p4 = scmp.lt.s32.totalorder %s2551_s0, %s2551_s0 }
  0x4d   :  { %p2558_p5 = por %p2557_p4, %p2556_p3 }
  0x4f   :  { %p2559_p6 = pnand %p2558_p5, %p2552_p2 }
  0x51   :  { %2562 = shalt.err (!%p2559_p6)
}
  0x52   :  { %105 = dma.hbm_to_vmem [thread:$0]  %s3246_s8, 2048, %s100_s13, [#allocation16], %s2623_s4, %s2623_s4, %s2624_s17  }
  0x53   :  { %2603 = dma.done.wait [#allocation7], 16  }
  0x54   :  { %2604 = vsyncadd [#allocation7], 4294967280 }
  0x55   :  { %2605 = dma.done.wait [#allocation5], 4096  }
  0x56   :  { %2606 = vsyncadd [#allocation5], 4294963200 }
  0x57   :  { %2607 = dma.done.wait [#allocation10], 3088  }
  0x58   :  { %2608 = vsyncadd [#allocation10], 4294964208 }
  0x59   :  { %2609 = dma.done.wait [#allocation13], 3088  }
  0x5a   :  { %2610 = vsyncadd [#allocation13], 4294964208 }
  0x5b   :  { %2611 = dma.done.wait [#allocation16], 2048  }
  0x5c   :  { %2612 = vsyncadd [#allocation16], 4294965248 }
  0x5d   :  { %129 = sfence }
  0x5e   :  { %v2232_v0 = vld [vmem:[#allocation11 + $0xac] ss:$12 sps:$4 sm:$0xff]   ;;  %v2234_v1 = vld [vmem:[#allocation11 + $0xa8] ss:$12 sps:$4 sm:$0xff]   ;;  %v2628_v2 = vmov 0.0   ;;  %v2629_v3 = vmov 0  }
  0x5f   :  { %2036 = vmatprep.subr.bf16.mxu1 %v2628_v2  ;;  %530 = vst [vmem:[#allocation3] sm:$0xff] %v2628_v2  ;;  %446 = vmatprep.mubr.bf16.mxu0 %v2629_v3  ;;  %s131_s7 = sld [smem:[#allocation4]]  ;;  %v2235_v4 = vld [vmem:[#allocation11 + $0x94] ss:$12 sps:$4 sm:$0xff]   ;;  %v2237_v5 = vld [vmem:[#allocation11 + $0x90] ss:$12 sps:$4 sm:$0xff]  }
  0x60   :  { %414 = vmatprep.subr.bf16.mxu0 %v2232_v0  ;;  %v2238_v6 = vld [vmem:[#allocation11 + $0x7c] ss:$12 sps:$4 sm:$0xff]   ;;  %s1854_s8 = sld [smem:[#allocation4 + $0x1]]  ;;  %v2240_v7 = vld [vmem:[#allocation11 + $0x78] ss:$12 sps:$4 sm:$0xff]   ;;  %vm135_vm0 = vcmask 1040384  }
  0x61   :  { %415 = vmatpush1.bf16.msra.mxu0 %v2234_v1  ;;  %v2241_v8 = vld [vmem:[#allocation11 + $0x64] ss:$12 sps:$4 sm:$0xff]   ;;  %vm136_vm1 = vsmask.f32 256  ;;  %s2729_s30 = sld [smem:[#allocation4 + $0x2]]  ;;  %vm166_vm3 = vcmask 1041409  }
  0x62   :  { %416 = vmatprep.subr.bf16.mxu0 %v2235_v4  ;;  %v2243_v9 = vld [vmem:[#allocation11 + $0x60] ss:$12 sps:$4 sm:$0xff]   ;;  %v2256_v10 = vld [vmem:[#allocation11 + $0xb0] ss:$12 sps:$4 sm:$0xff]   ;;  %vm137_vm2 = vmand %vm135_vm0, %vm136_vm1  ;;  %s2732_s16 = sld [smem:[#allocation4 + $0x3]]  ;;  %vm198_vm6 = vcmask 1042434  }
  0x63   :  { %v2244_v12 = vld [vmem:[#allocation11 + $0x4c] ss:$12 sps:$4 sm:$0xff]   ;;  %v138_v14 = vld [vmem:[#allocation2] sm:$0x1]  ;;  %2037 = vmatpush3.bf16.msra.mxu1 %v2256_v10  ;;  %v2246_v16 = vld [vmem:[#allocation11 + $0x48] ss:$12 sps:$4 sm:$0xff]  }
  0x64   :  { %v2247_v17 = vld [vmem:[#allocation11 + $0x34] ss:$12 sps:$4 sm:$0xff]   ;;  %s2734_s4 = sld [smem:[#allocation4 + $0x4]]  ;;  %2038 = vmatprep.subr.bf16.mxu1 %v2628_v2  ;;  %vm167_vm4 = vsmask.f32 1280  ;;  %vm230_vm10 = vcmask 1043459  }
  0x65   :  { %417 = vmatpush1.bf16.msra.mxu0 %v2237_v5  ;;  %s132_s14 = scalar_lea.vmem [#allocation8], %s131_s7  ;;  %s2737_s17 = sld [smem:[#allocation4 + $0x5]]  ;;  %vm152_vm5 = vsmask.f32 7938  ;;  %v2249_v21 = vld [vmem:[#allocation11 + $0x30] ss:$12 sps:$4 sm:$0xff]   ;;  %vm2743_vm8 = vmand %vm166_vm3, %vm167_vm4 }
  0x66   :  { %418 = vmatprep.subr.bf16.mxu0 %v2238_v6  ;;  %v133_v11 = vld [vmem:[%s132_s14] sm:$0x1]  ;;  %s142_s15 = scalar_lea.vmem [#allocation8], %s1854_s8  ;;  %v169_v23 = vld [vmem:[#allocation2] sm:$0x2]  ;;  %s2740_s19 = sld [smem:[#allocation4 + $0x6]]  ;;  %vm2751_vm11 = vmand %vm135_vm0, %vm152_vm5 }
  0x67   :  { %v134_v13 = vpack.c.bf16 %v133_v11, %v133_v11  ;;  %v143_v15 = vld [vmem:[%s142_s15] sm:$0x1]  ;;  %s158_s18 = scalar_lea.vmem [#allocation8], %s2729_s30  ;;  %vm184_vm7 = vsmask.f32 7942  ;;  %s2747_s20 = sld [smem:[#allocation4 + $0x7]] }
  0x68   :  { %v1948_v19 = vpack.c.bf16 %v143_v15, %v143_v15  ;;  %v159_v20 = vld [vmem:[%s158_s18] sm:$0x1]  ;;  %v2250_v24 = vld [vmem:[#allocation11 + $0x1c] ss:$12 sps:$4 sm:$0xff]   ;;  %vm199_vm9 = vsmask.f32 2304  ;;  %vm185_vm15 = vmand %vm166_vm3, %vm184_vm7 }
  0x69   :  { %419 = vmatpush1.bf16.msra.mxu0 %v2240_v7  ;;  %v139_v18 = vsel %vm137_vm2, %v134_v13, %v138_v14  ;;  %v1949_v22 = vpack.c.bf16 %v159_v20, %v159_v20  ;;  %s173_s21 = scalar_lea.vmem [#allocation8], %s2732_s16  ;;  %v2259_v30 = vld [vmem:[#allocation11 + $0x98] ss:$12 sps:$4 sm:$0xff]   ;;  %v201_v35 = vld [vmem:[#allocation2] sm:$0x4]  ;;  %vm2764_vm13 = vmand %vm198_vm6, %vm199_vm9  ;;  %vm2630_vm0 = vmmov 0  }
  0x6a   :  { %420 = vmatprep.subr.bf16.mxu0 %v2241_v8  ;;  %140 = vst [vmem:[#allocation2] sm:$0x1] %v139_v18  ;;  %v149_v25 = vshll.u32 %v1948_v19, 16  ;;  %v174_v29 = vld [vmem:[%s173_s21] sm:$0x1]  ;;  %s190_s22 = scalar_lea.vmem [#allocation8], %s2734_s4  ;;  %2039 = vmatpush3.bf16.msra.mxu1 %v2259_v30 }
  0x6b   :  { %v164_v28 = vrot.slane %v1949_v22, 7  ;;  %v2252_v31 = vld [vmem:[#allocation11 + $0x18] ss:$12 sps:$4 sm:$0xff]   ;;  %v1950_v33 = vpack.c.bf16 %v174_v29, %v174_v29  ;;  %v191_v34 = vld [vmem:[%s190_s22] sm:$0x1]  ;;  %s205_s23 = scalar_lea.vmem [#allocation8], %s2737_s17  ;;  %2040 = vmatprep.subr.bf16.mxu1 %v2628_v2  ;;  %2052 = vmatprep.mubr.msk.bf16.mxu1 %vm2630_vm0, %v2628_v2 }
  0x6c   :  { %v2253_v36 = vld [vmem:[#allocation11 + $0x4] ss:$12 sps:$4 sm:$0xff]   ;;  %v1951_v38 = vpack.c.bf16 %v191_v34, %v191_v34  ;;  %vm231_vm12 = vsmask.f32 3328  ;;  %s222_s24 = scalar_lea.vmem [#allocation8], %s2740_s19 }
  0x6d   :  { %421 = vmatpush1.bf16.msra.mxu0 %v2243_v9  ;;  %v170_v32 = vsel %vm2743_vm8, %v164_v28, %v169_v23  ;;  %v206_v39 = vld [vmem:[%s205_s23] sm:$0x1]  ;;  %v180_v41 = vshll.u32 %v1950_v33, 16  ;;  %v2263_v46 = vld [vmem:[#allocation11 + $0x80] ss:$12 sps:$4 sm:$0xff]   ;;  %s237_s25 = scalar_lea.vmem [#allocation8], %s2747_s20  ;;  %vm2775_vm14 = vmand %vm230_vm10, %vm231_vm12 }
  0x6e   :  { %422 = vmatprep.subr.bf16.mxu0 %v2244_v12  ;;  %171 = vst [vmem:[#allocation2] sm:$0x2] %v170_v32  ;;  %v1952_v43 = vpack.c.bf16 %v206_v39, %v206_v39  ;;  %v196_v44 = vrot.slane %v1951_v38, 6  ;;  %v223_v45 = vld [vmem:[%s222_s24] sm:$0x1]  ;;  %2041 = vmatpush3.bf16.msra.mxu1 %v2263_v46 }
  0x6f   :  { %v2255_v47 = vld [vmem:[#allocation11] ss:$12 sps:$4 sm:$0xff]   ;;  %v1953_v48 = vpack.c.bf16 %v223_v45, %v223_v45  ;;  %v233_v49 = vld [vmem:[#allocation2] sm:$0x8]  ;;  %v238_v50 = vld [vmem:[%s237_s25] sm:$0x1]  ;;  %2042 = vmatprep.subr.bf16.mxu1 %v2628_v2  ;;  %v745_v45 = vlaneseq }
  0x70   :  { %v182_v51 = vrot.slane %v180_v41, 7  ;;  %v202_v52 = vsel %vm2764_vm13, %v196_v44, %v201_v35  ;;  %v1954_v54 = vpack.c.bf16 %v238_v50, %v238_v50  ;;  %v212_v55 = vshll.u32 %v1952_v43, 16  ;;  %v2782_v57 = vld [vmem:[#allocation12 + $0xac] ss:$12 sps:$4 sm:$0xff]   ;;  %v2267_v58 = vld [vmem:[#allocation11 + $0x68] ss:$12 sps:$4 sm:$0xff]  }
  0x71   :  { %423 = vmatpush1.bf16.msra.mxu0 %v2246_v16  ;;  %v154_v37 = vld [vmem:[#allocation2] sm:$0x1]  ;;  %203 = vst [vmem:[#allocation2] sm:$0x4] %v202_v52  ;;  %v228_v56 = vrot.slane %v1953_v48, 5  ;;  %v2922_v46 = vshrl.u32 %v745_v45, 7 }
  0x72   :  { %424 = vmatprep.subr.bf16.mxu0 %v2247_v17  ;;  %v155_v40 = vsel %vm2751_vm11, %v149_v25, %v154_v37  ;;  %vm216_vm1 = vsmask.f32 7946  ;;  %v244_v62 = vshll.u32 %v1954_v54, 16  ;;  %2043 = vmatpush3.bf16.msra.mxu1 %v2267_v58  ;;  %v214_v63 = vrot.slane %v212_v55, 6  ;;  %v2271_v0 = vld [vmem:[#allocation11 + $0x50] ss:$12 sps:$4 sm:$0xff]  }
  0x73   :  { %156 = vst [vmem:[#allocation2] sm:$0x1] %v155_v40  ;;  %v234_v60 = vsel %vm2775_vm14, %v228_v56, %v233_v49  ;;  %2044 = vmatprep.subr.bf16.mxu1 %v2628_v2  ;;  %vm217_vm2 = vmand %vm198_vm6, %vm216_vm1  ;;  %vm248_vm3 = vsmask.f32 7950  ;;  %v2275_v5 = vld [vmem:[#allocation11 + $0x38] ss:$12 sps:$4 sm:$0xff]  }
  0x74   :  { %235 = vst [vmem:[#allocation2] sm:$0x8] %v234_v60  ;;  %v246_v4 = vrot.slane %v244_v62, 5  ;;  %vm249_vm4 = vmand %vm230_vm10, %vm248_vm3  ;;  %v2279_v9 = vld [vmem:[#allocation11 + $0x20] ss:$12 sps:$4 sm:$0xff]  }
  0x75   :  { %425 = vmatpush1.bf16.msra.mxu0 %v2249_v21  ;;  %v186_v59 = vld [vmem:[#allocation2] sm:$0x2]  ;;  %v2283_v10 = vld [vmem:[#allocation11 + $0x8] ss:$12 sps:$4 sm:$0xff]   ;;  %v2808_v17 = vld [vmem:[#allocation12 + $0x98] ss:$12 sps:$4 sm:$0xff]  }
  0x76   :  { %426 = vmatprep.subr.bf16.mxu0 %v2250_v24  ;;  %v187_v61 = vsel %vm185_vm15, %v182_v51, %v186_v59  ;;  %2045 = vmatpush3.bf16.msra.mxu1 %v2271_v0  ;;  %v2795_v11 = vld [vmem:[#allocation12 + $0xa8] ss:$12 sps:$4 sm:$0xff]   ;;  %v2799_v14 = vld [vmem:[#allocation12 + $0x90] ss:$12 sps:$4 sm:$0xff]   ;;  %v2811_v18 = vld [vmem:[#allocation12 + $0x78] ss:$12 sps:$4 sm:$0xff]  }
  0x77   :  { %188 = vst [vmem:[#allocation2] sm:$0x2] %v187_v61  ;;  %2046 = vmatprep.subr.bf16.mxu1 %v2628_v2  ;;  %v2797_v12 = vld [vmem:[#allocation12 + $0x94] ss:$12 sps:$4 sm:$0xff]   ;;  %v2801_v15 = vld [vmem:[#allocation12 + $0xb0] ss:$12 sps:$4 sm:$0xff]  }
  0x78   :  { %v218_v1 = vld [vmem:[#allocation2] sm:$0x4]  ;;  %v2803_v16 = vld [vmem:[#allocation12 + $0x7c] ss:$12 sps:$4 sm:$0xff]   ;;  %v2816_v19 = vld [vmem:[#allocation12 + $0x64] ss:$12 sps:$4 sm:$0xff]  }
  0x79   :  { %427 = vmatpush1.bf16.msra.mxu0 %v2252_v31  ;;  %v219_v6 = vsel %vm217_vm2, %v214_v63, %v218_v1  ;;  %v2822_v20 = vld [vmem:[#allocation12 + $0x80] ss:$12 sps:$4 sm:$0xff]   ;;  %v2832_v23 = vld [vmem:[#allocation12 + $0x68] ss:$12 sps:$4 sm:$0xff]   ;;  %v2842_v26 = vld [vmem:[#allocation12 + $0x50] ss:$12 sps:$4 sm:$0xff]  }
  0x7a   :  { %428 = vmatprep.subr.bf16.mxu0 %v2253_v36  ;;  %220 = vst [vmem:[#allocation2] sm:$0x4] %v219_v6  ;;  %2047 = vmatpush3.bf16.msra.mxu1 %v2275_v5  ;;  %v2826_v21 = vld [vmem:[#allocation12 + $0x60] ss:$12 sps:$4 sm:$0xff]   ;;  %v2836_v24 = vld [vmem:[#allocation12 + $0x48] ss:$12 sps:$4 sm:$0xff]  }
  0x7b   :  { %v250_v7 = vld [vmem:[#allocation2] sm:$0x8]  ;;  %2048 = vmatprep.subr.bf16.mxu1 %v2628_v2  ;;  %v2829_v22 = vld [vmem:[#allocation12 + $0x4c] ss:$12 sps:$4 sm:$0xff]   ;;  %v2846_v27 = vld [vmem:[#allocation12 + $0x30] ss:$12 sps:$4 sm:$0xff]  }
  0x7c   :  { %v251_v8 = vsel %vm249_vm4, %v246_v4, %v250_v7  ;;  %v2839_v25 = vld [vmem:[#allocation12 + $0x34] ss:$12 sps:$4 sm:$0xff]   ;;  %v2849_v28 = vld [vmem:[#allocation12 + $0x1c] ss:$12 sps:$4 sm:$0xff]   ;;  %v2852_v29 = vld [vmem:[#allocation12 + $0x38] ss:$12 sps:$4 sm:$0xff]  }
  0x7d   :  { %429 = vmatpush1.bf16.msra.mxu0 %v2255_v47  ;;  %252 = vst [vmem:[#allocation2] sm:$0x8] %v251_v8  ;;  %v2856_v30 = vld [vmem:[#allocation12 + $0x18] ss:$12 sps:$4 sm:$0xff]   ;;  %v2862_v32 = vld [vmem:[#allocation12 + $0x20] ss:$12 sps:$4 sm:$0xff]  }
  0x7e   :  { %661 = vmatprep.subr.bf16.mxu0 %v2782_v57  ;;  %2049 = vmatpush3.bf16.msra.mxu1 %v2279_v9  ;;  %v2859_v31 = vld [vmem:[#allocation12 + $0x4] ss:$12 sps:$4 sm:$0xff]   ;;  %v2866_v33 = vld [vmem:[#allocation12] ss:$12 sps:$4 sm:$0xff]   ;;  %v2868_v34 = vld [vmem:[#allocation9] sm:$0x1] }
  0x7f   :  { %2050 = vmatprep.subr.bf16.mxu1 %v2628_v2  ;;  %v2872_v35 = vld [vmem:[#allocation12 + $0x8] ss:$12 sps:$4 sm:$0xff]   ;;  %v532_v36 = vpack.c.bf16 %v2868_v34, %v2868_v34  ;;  %v2925_v47 = vsub.s32 0, %v2922_v46  ;;  %v527_v48 = vld [vmem:[%s3243_s5] sm:$0x3]  ;;  %v751_v51 = vsub.s32 1, %v2922_v46 }
  0x80   :  { %v2942_v8 = vld [vmem:[#allocation14] sm:$0x1] }
  0x81   :  { %v2931_v49 = vrot.slane %v527_v48, %v2925_v47  ;;  %v2938_v59 = vrot.slane %v527_v48, %v751_v51 }
  0x82   :  { %2051 = vmatpush3.bf16.msra.mxu1 %v2283_v10 }
  0x83   :  { %2056 = vmatprep.subr.bf16.mxu1 %v2628_v2 }
  0x84   :  { %v253_v13 = vld [vmem:[#allocation2] sm:$0xf] }
  0x85   :  { %447 = vmatmul.mubr.bf16.vlgmr.msra.gmra.mxu0 %v253_v13  ;;  %2053 = vmatmul.mubr.bf16.vlgmr.msra.gmra.mxu1 %v253_v13 }
  0x86   :  { %662 = vmatpush1.bf16.msra.mxu0 %v2795_v11  ;;  %693 = vmatprep.mubr.bf16.mxu0 %v2629_v3 }
  0x87   :  { %663 = vmatprep.subr.bf16.mxu0 %v2797_v12  ;;  %2057 = vmatpush3.bf16.msra.mxu1 %v2801_v15 }
  0x88   :  { %2072 = vmatprep.mubr.msk.bf16.mxu1 %vm2630_vm0, %v2628_v2  ;;  %2058 = vmatprep.subr.bf16.mxu1 %v2628_v2 }
  0x8a   :  { %664 = vmatpush1.bf16.msra.mxu0 %v2799_v14 }
  0x8b   :  { %665 = vmatprep.subr.bf16.mxu0 %v2803_v16  ;;  %2059 = vmatpush3.bf16.msra.mxu1 %v2808_v17 }
  0x8c   :  { %2060 = vmatprep.subr.bf16.mxu1 %v2628_v2 }
  0x8e   :  { %666 = vmatpush1.bf16.msra.mxu0 %v2811_v18 }
  0x8f   :  { %667 = vmatprep.subr.bf16.mxu0 %v2816_v19  ;;  %2061 = vmatpush3.bf16.msra.mxu1 %v2822_v20 }
  0x90   :  { %2062 = vmatprep.subr.bf16.mxu1 %v2628_v2 }
  0x92   :  { %668 = vmatpush1.bf16.msra.mxu0 %v2826_v21 }
  0x93   :  { %669 = vmatprep.subr.bf16.mxu0 %v2829_v22  ;;  %2063 = vmatpush3.bf16.msra.mxu1 %v2832_v23 }
  0x94   :  { %2064 = vmatprep.subr.bf16.mxu1 %v2628_v2 }
  0x96   :  { %670 = vmatpush1.bf16.msra.mxu0 %v2836_v24 }
  0x97   :  { %671 = vmatprep.subr.bf16.mxu0 %v2839_v25  ;;  %2065 = vmatpush3.bf16.msra.mxu1 %v2842_v26 }
  0x98   :  { %2066 = vmatprep.subr.bf16.mxu1 %v2628_v2 }
  0x9a   :  { %672 = vmatpush1.bf16.msra.mxu0 %v2846_v27 }
  0x9b   :  { %673 = vmatprep.subr.bf16.mxu0 %v2849_v28  ;;  %2067 = vmatpush3.bf16.msra.mxu1 %v2852_v29 }
  0x9c   :  { %2068 = vmatprep.subr.bf16.mxu1 %v2628_v2 }
  0x9e   :  { %674 = vmatpush1.bf16.msra.mxu0 %v2856_v30 }
  0x9f   :  { %675 = vmatprep.subr.bf16.mxu0 %v2859_v31  ;;  %2069 = vmatpush3.bf16.msra.mxu1 %v2862_v32 }
  0xa0   :  { %2070 = vmatprep.subr.bf16.mxu1 %v2628_v2 }
  0xa2   :  { %676 = vmatpush1.bf16.msra.mxu0 %v2866_v33 }
  0xa3   :  { %780 = vmatprep.subr.bf16.mxu0 %v2782_v57  ;;  %2071 = vmatpush3.bf16.msra.mxu1 %v2872_v35 }
  0xa4   :  { %2076 = vmatprep.subr.bf16.mxu1 %v2628_v2 }
  0xa5   :  { %694 = vmatmul.mubr.bf16.vlgmr.msra.gmra.mxu0 %v532_v36 }
  0xa6   :  { %781 = vmatpush1.bf16.msra.mxu0 %v2795_v11  ;;  %812 = vmatprep.mubr.bf16.mxu0 %v2629_v3 }
  0xa7   :  { %2073 = vmatmul.mubr.bf16.vlgmr.msra.gmra.mxu1 %v532_v36  ;;  %782 = vmatprep.subr.bf16.mxu0 %v2797_v12  ;;  %v2948_v36 = vld [vmem:[%s3244_s6] sm:$0x1] }
  0xa8   :  { %2077 = vmatpush3.bf16.msra.mxu1 %v2801_v15  ;;  %2092 = vmatprep.mubr.msk.bf16.mxu1 %vm2630_vm0, %v2628_v2 }
  0xa9   :  { %2078 = vmatprep.subr.bf16.mxu1 %v2628_v2 }
  0xaa   :  { %783 = vmatpush1.bf16.msra.mxu0 %v2799_v14 }
  0xab   :  { %784 = vmatprep.subr.bf16.mxu0 %v2803_v16 }
  0xac   :  { %2079 = vmatpush3.bf16.msra.mxu1 %v2808_v17 }
  0xad   :  { %2080 = vmatprep.subr.bf16.mxu1 %v2628_v2 }
  0xae   :  { %785 = vmatpush1.bf16.msra.mxu0 %v2811_v18 }
  0xaf   :  { %786 = vmatprep.subr.bf16.mxu0 %v2816_v19 }
  0xb0   :  { %2081 = vmatpush3.bf16.msra.mxu1 %v2822_v20 }
  0xb1   :  { %2082 = vmatprep.subr.bf16.mxu1 %v2628_v2 }
  0xb2   :  { %787 = vmatpush1.bf16.msra.mxu0 %v2826_v21 }
  0xb3   :  { %788 = vmatprep.subr.bf16.mxu0 %v2829_v22 }
  0xb4   :  { %2083 = vmatpush3.bf16.msra.mxu1 %v2832_v23 }
  0xb5   :  { %2084 = vmatprep.subr.bf16.mxu1 %v2628_v2 }
  0xb6   :  { %789 = vmatpush1.bf16.msra.mxu0 %v2836_v24 }
  0xb7   :  { %790 = vmatprep.subr.bf16.mxu0 %v2839_v25 }
  0xb8   :  { %2085 = vmatpush3.bf16.msra.mxu1 %v2842_v26 }
  0xb9   :  { %2086 = vmatprep.subr.bf16.mxu1 %v2628_v2 }
  0xba   :  { %791 = vmatpush1.bf16.msra.mxu0 %v2846_v27 }
  0xbb   :  { %792 = vmatprep.subr.bf16.mxu0 %v2849_v28 }
  0xbc   :  { %2087 = vmatpush3.bf16.msra.mxu1 %v2852_v29 }
  0xbd   :  { %2088 = vmatprep.subr.bf16.mxu1 %v2628_v2 }
  0xbe   :  { %793 = vmatpush1.bf16.msra.mxu0 %v2856_v30 }
  0xbf   :  { %794 = vmatprep.subr.bf16.mxu0 %v2859_v31 }
  0xc0   :  { %2089 = vmatpush3.bf16.msra.mxu1 %v2862_v32 }
  0xc1   :  { %2090 = vmatprep.subr.bf16.mxu1 %v2628_v2 }
  0xc2   :  { %795 = vmatpush1.bf16.msra.mxu0 %v2866_v33 }
  0xc3   :  { %910 = vmatprep.subr.bf16.mxu0 %v2782_v57 }
  0xc4   :  { %2091 = vmatpush3.bf16.msra.mxu1 %v2872_v35 }
  0xc5   :  { %2096 = vmatprep.subr.bf16.mxu1 %v2628_v2 }
 0x145   :  { %v2916_v37 = vpop.f32.mrf.mxu0  ;;  %v2920_v39 = vpop.f32.mrf.mxu1 }
 0x147   :  { %v2918_v38 = vpop.f32.mrf.mxu0  ;;  %v2054_v41 = vpop.f32.mrf.mxu1 }
 0x149   :  { %v452_v40 = vpop.f32.mrf.mxu0  ;;  %v492_v43 = vpop.f32.mrf.mxu1 }
 0x14a   :  { %v769_v40 = vadd.f32 %v2948_v36, %v2920_v39 }
 0x14b   :  { %v453_v42 = vpop.f32.mrf.mxu0  ;;  %v2055_v44 = vpop.f32.mrf.mxu1 }
 0x165   :  { %v695_v50 = vpop.f32.mrf.mxu0 }
 0x166   :  { %v742_v52 = vadd.f32 %v695_v50, %v2916_v37 }
 0x167   :  { %v697_v53 = vpop.f32.mrf.mxu0  ;;  %v736_v54 = vpop.f32.mrf.mxu1 }
 0x168   :  { %v755_v55 = vadd.f32 %v2931_v49, %v742_v52  ;;  %v743_v61 = vadd.f32 %v697_v53, %v2918_v38  ;;  %v770_v10 = vadd.f32 %v736_v54, %v2942_v8 }
 0x169   :  { %v699_v56 = vpop.f32.mrf.mxu0  ;;  %v2074_v58 = vpop.f32.mrf.mxu1 }
 0x16a   :  { %v1916_v60 = vmul.f32 -1.442695, %v755_v55  ;;  %v756_v1 = vadd.f32 %v2938_v59, %v743_v61 }
 0x16b   :  { %v700_v62 = vpop.f32.mrf.mxu0  ;;  %v739_v63 = vpop.f32.mrf.mxu1 }
 0x16c   :  { %2320 = vpow2.f32 %v1916_v60  ;;  %v1917_v4 = vmul.f32 -1.442695, %v756_v1 }
 0x16d   :  { %v2075_v0 = vpop.f32.mrf.mxu1 }
 0x16e   :  { %2322 = vpow2.f32 %v1917_v4 }
 0x179   :  { %v2321_v5 = vpop.eup %2320 }
 0x17a   :  { %v760_v6 = vadd.f32 1.0, %v2321_v5 }
 0x17b   :  { %v2323_v7 = vpop.eup %2322 }
 0x17c   :  { %2324 = vrcp.f32 %v760_v6  ;;  %v766_v9 = vadd.f32 1.0, %v2323_v7 }
 0x17e   :  { %2326 = vrcp.f32 %v766_v9 }
 0x189   :  { %v2325_v13 = vpop.eup %2324 }
 0x18a   :  { %v771_v41 = vmul.f32 %v2325_v13, %v770_v10 }
 0x18b   :  { %v2327_v43 = vpop.eup %2326 }
 0x18c   :  { %v772_v42 = vadd.f32 %v771_v41, %v769_v40  ;;  %v774_v44 = vsub.f32 1.0, %v2327_v43  ;;  %v776_v50 = vmul.f32 %v2327_v43, %v2868_v34 }
 0x18e   :  { %2328 = vtanh.f32 %v772_v42  ;;  %v887_v42 = vrot.slane %v2948_v36, %v2925_v47 }
 0x19b   :  { %v2329_v45 = vpop.eup %2328 }
 0x19c   :  { %v775_v48 = vmul.f32 %v2329_v45, %v774_v44 }
 0x19e   :  { %v2953_v52 = vadd.f32 %v776_v50, %v775_v48  ;;  %v3001_v48 = vadd.f32 %v887_v42, %v2920_v39 }
 0x1a0   :  { %778 = vst [vmem:[#allocation3] sm:$0x1] %v2953_v52  ;;  %v779_v53 = vpack.c.bf16 %v2953_v52, %v2953_v52 }
 0x1a2   :  { %813 = vmatmul.mubr.bf16.vlgmr.msra.gmra.mxu0 %v779_v53  ;;  %2093 = vmatmul.mubr.bf16.vlgmr.msra.gmra.mxu1 %v779_v53 }
 0x1a3   :  { %911 = vmatpush1.bf16.msra.mxu0 %v2795_v11  ;;  %2097 = vmatpush3.bf16.msra.mxu1 %v2801_v15 }
 0x1a4   :  { %912 = vmatprep.subr.bf16.mxu0 %v2797_v12  ;;  %2098 = vmatprep.subr.bf16.mxu1 %v2628_v2 }
 0x1a5   :  { %942 = vmatprep.mubr.bf16.mxu0 %v2629_v3  ;;  %2112 = vmatprep.mubr.msk.bf16.mxu1 %vm2630_vm0, %v2628_v2 }
 0x1a7   :  { %913 = vmatpush1.bf16.msra.mxu0 %v2799_v14  ;;  %2099 = vmatpush3.bf16.msra.mxu1 %v2808_v17 }
 0x1a8   :  { %914 = vmatprep.subr.bf16.mxu0 %v2803_v16  ;;  %2100 = vmatprep.subr.bf16.mxu1 %v2628_v2 }
 0x1ab   :  { %915 = vmatpush1.bf16.msra.mxu0 %v2811_v18  ;;  %2101 = vmatpush3.bf16.msra.mxu1 %v2822_v20 }
 0x1ac   :  { %916 = vmatprep.subr.bf16.mxu0 %v2816_v19  ;;  %2102 = vmatprep.subr.bf16.mxu1 %v2628_v2 }
 0x1af   :  { %917 = vmatpush1.bf16.msra.mxu0 %v2826_v21  ;;  %2103 = vmatpush3.bf16.msra.mxu1 %v2832_v23 }
 0x1b0   :  { %918 = vmatprep.subr.bf16.mxu0 %v2829_v22  ;;  %2104 = vmatprep.subr.bf16.mxu1 %v2628_v2 }
 0x1b3   :  { %919 = vmatpush1.bf16.msra.mxu0 %v2836_v24  ;;  %2105 = vmatpush3.bf16.msra.mxu1 %v2842_v26 }
 0x1b4   :  { %920 = vmatprep.subr.bf16.mxu0 %v2839_v25  ;;  %2106 = vmatprep.subr.bf16.mxu1 %v2628_v2 }
 0x1b7   :  { %921 = vmatpush1.bf16.msra.mxu0 %v2846_v27  ;;  %2107 = vmatpush3.bf16.msra.mxu1 %v2852_v29 }
 0x1b8   :  { %922 = vmatprep.subr.bf16.mxu0 %v2849_v28  ;;  %2108 = vmatprep.subr.bf16.mxu1 %v2628_v2 }
 0x1bb   :  { %923 = vmatpush1.bf16.msra.mxu0 %v2856_v30  ;;  %2109 = vmatpush3.bf16.msra.mxu1 %v2862_v32 }
 0x1bc   :  { %924 = vmatprep.subr.bf16.mxu0 %v2859_v31  ;;  %2110 = vmatprep.subr.bf16.mxu1 %v2628_v2 }
 0x1bf   :  { %925 = vmatpush1.bf16.msra.mxu0 %v2866_v33  ;;  %2111 = vmatpush3.bf16.msra.mxu1 %v2872_v35 }
 0x1c0   :  { %1032 = vmatprep.subr.bf16.mxu0 %v2782_v57  ;;  %2116 = vmatprep.subr.bf16.mxu1 %v2628_v2 }
 0x262   :  { %v814_v34 = vpop.f32.mrf.mxu0  ;;  %v855_v54 = vpop.f32.mrf.mxu1 }
 0x263   :  { %v863_v55 = vrot.slane %v814_v34, 7  ;;  %v890_v41 = vadd.f32 %v855_v54, %v2942_v8 }
 0x264   :  { %v816_v56 = vpop.f32.mrf.mxu0  ;;  %v2094_v58 = vpop.f32.mrf.mxu1 }
 0x265   :  { %v867_v60 = vadd.f32 %v863_v55, %v2916_v37  ;;  %v864_v61 = vrot.slane %v816_v56, 7  ;;  %v892_v44 = vrot.slane %v890_v41, 7  ;;  %v900_v56 = vrot.slane %v2953_v52, 7 }
 0x266   :  { %v818_v62 = vpop.f32.mrf.mxu0  ;;  %v858_v63 = vpop.f32.mrf.mxu1 }
 0x267   :  { %v869_v0 = vadd.f32 %v867_v60, %v2931_v49  ;;  %v868_v6 = vadd.f32 %v864_v61, %v2918_v38 }
 0x268   :  { %v819_v1 = vpop.f32.mrf.mxu0  ;;  %v2095_v4 = vpop.f32.mrf.mxu1 }
 0x269   :  { %v1918_v5 = vmul.f32 -1.442695, %v869_v0  ;;  %v870_v7 = vadd.f32 %v868_v6, %v2938_v59 }
 0x26b   :  { %2330 = vpow2.f32 %v1918_v5  ;;  %v1919_v9 = vmul.f32 -1.442695, %v870_v7 }
 0x26d   :  { %2332 = vpow2.f32 %v1919_v9 }
 0x278   :  { %v2331_v10 = vpop.eup %2330 }
 0x279   :  { %v874_v13 = vadd.f32 1.0, %v2331_v10 }
 0x27a   :  { %v2333_v40 = vpop.eup %2332 }
 0x27b   :  { %2334 = vrcp.f32 %v874_v13  ;;  %v880_v43 = vadd.f32 1.0, %v2333_v40 }
 0x27d   :  { %2336 = vrcp.f32 %v880_v43 }
 0x288   :  { %v2335_v45 = vpop.eup %2334 }
 0x289   :  { %v894_v50 = vmul.f32 %v2335_v45, %v892_v44 }
 0x28a   :  { %v2337_v34 = vpop.eup %2336 }
 0x28b   :  { %v895_v53 = vadd.f32 %v894_v50, %v3001_v48  ;;  %v897_v55 = vsub.f32 1.0, %v2337_v34  ;;  %v902_v60 = vmul.f32 %v2337_v34, %v900_v56 }
 0x28d   :  { %2338 = vtanh.f32 %v895_v53 }
 0x29a   :  { %v2339_v58 = vpop.eup %2338 }
 0x29b   :  { %v898_v54 = vmul.f32 %v2339_v58, %v897_v55 }
 0x29d   :  { %v3005_v61 = vadd.f32 %v902_v60, %v898_v54 }
 0x29f   :  { %904 = vst [vmem:[#allocation3] sm:$0x2] %v3005_v61  ;;  %v905_v39 = vpack.c.bf16 %v3005_v61, %v3005_v61 }
 0x2a1   :  { %v907_v36 = vshrl.u32 %v905_v39, 16 }
 0x2a3   :  { %943 = vmatmul.mubr.bf16.vlgmr.msra.gmra.mxu0 %v907_v36  ;;  %2113 = vmatmul.mubr.bf16.vlgmr.msra.gmra.mxu1 %v907_v36  ;;  %v1023_v36 = vrot.slane %v3005_v61, 7 }
 0x2a4   :  { %1033 = vmatpush1.bf16.msra.mxu0 %v2795_v11  ;;  %2117 = vmatpush3.bf16.msra.mxu1 %v2801_v15 }
 0x2a5   :  { %1034 = vmatprep.subr.bf16.mxu0 %v2797_v12  ;;  %2118 = vmatprep.subr.bf16.mxu1 %v2628_v2 }
 0x2a6   :  { %1064 = vmatprep.mubr.bf16.mxu0 %v2629_v3  ;;  %2132 = vmatprep.mubr.msk.bf16.mxu1 %vm2630_vm0, %v2628_v2 }
 0x2a8   :  { %1035 = vmatpush1.bf16.msra.mxu0 %v2799_v14  ;;  %2119 = vmatpush3.bf16.msra.mxu1 %v2808_v17 }
 0x2a9   :  { %1036 = vmatprep.subr.bf16.mxu0 %v2803_v16  ;;  %2120 = vmatprep.subr.bf16.mxu1 %v2628_v2 }
 0x2ac   :  { %1037 = vmatpush1.bf16.msra.mxu0 %v2811_v18  ;;  %2121 = vmatpush3.bf16.msra.mxu1 %v2822_v20 }
 0x2ad   :  { %1038 = vmatprep.subr.bf16.mxu0 %v2816_v19  ;;  %2122 = vmatprep.subr.bf16.mxu1 %v2628_v2 }
 0x2b0   :  { %1039 = vmatpush1.bf16.msra.mxu0 %v2826_v21  ;;  %2123 = vmatpush3.bf16.msra.mxu1 %v2832_v23 }
 0x2b1   :  { %1040 = vmatprep.subr.bf16.mxu0 %v2829_v22  ;;  %2124 = vmatprep.subr.bf16.mxu1 %v2628_v2 }
 0x2b4   :  { %1041 = vmatpush1.bf16.msra.mxu0 %v2836_v24  ;;  %2125 = vmatpush3.bf16.msra.mxu1 %v2842_v26 }
 0x2b5   :  { %1042 = vmatprep.subr.bf16.mxu0 %v2839_v25  ;;  %2126 = vmatprep.subr.bf16.mxu1 %v2628_v2 }
 0x2b8   :  { %1043 = vmatpush1.bf16.msra.mxu0 %v2846_v27  ;;  %2127 = vmatpush3.bf16.msra.mxu1 %v2852_v29 }
 0x2b9   :  { %1044 = vmatprep.subr.bf16.mxu0 %v2849_v28  ;;  %2128 = vmatprep.subr.bf16.mxu1 %v2628_v2 }
 0x2bc   :  { %1045 = vmatpush1.bf16.msra.mxu0 %v2856_v30  ;;  %2129 = vmatpush3.bf16.msra.mxu1 %v2862_v32 }
 0x2bd   :  { %1046 = vmatprep.subr.bf16.mxu0 %v2859_v31  ;;  %2130 = vmatprep.subr.bf16.mxu1 %v2628_v2 }
 0x2c0   :  { %1047 = vmatpush1.bf16.msra.mxu0 %v2866_v33  ;;  %2131 = vmatpush3.bf16.msra.mxu1 %v2872_v35 }
 0x2c1   :  { %1156 = vmatprep.subr.bf16.mxu0 %v2782_v57  ;;  %2136 = vmatprep.subr.bf16.mxu1 %v2628_v2 }
 0x363   :  { %v944_v52 = vpop.f32.mrf.mxu0  ;;  %v985_v62 = vpop.f32.mrf.mxu1 }
 0x364   :  { %v993_v63 = vrot.slane %v944_v52, 6  ;;  %v1013_v53 = vadd.f32 %v985_v62, %v2942_v8 }
 0x365   :  { %v946_v0 = vpop.f32.mrf.mxu0  ;;  %v2114_v1 = vpop.f32.mrf.mxu1 }
 0x366   :  { %v997_v4 = vadd.f32 %v993_v63, %v2916_v37  ;;  %v994_v5 = vrot.slane %v946_v0, 6  ;;  %v1015_v55 = vrot.slane %v1013_v53, 6 }
 0x367   :  { %v948_v6 = vpop.f32.mrf.mxu0  ;;  %v988_v7 = vpop.f32.mrf.mxu1 }
 0x368   :  { %v999_v9 = vadd.f32 %v997_v4, %v2931_v49  ;;  %v998_v41 = vadd.f32 %v994_v5, %v2918_v38 }
 0x369   :  { %v949_v10 = vpop.f32.mrf.mxu0  ;;  %v2115_v13 = vpop.f32.mrf.mxu1 }
 0x36a   :  { %v1920_v40 = vmul.f32 -1.442695, %v999_v9  ;;  %v1000_v42 = vadd.f32 %v998_v41, %v2938_v59 }
 0x36c   :  { %2340 = vpow2.f32 %v1920_v40  ;;  %v1921_v43 = vmul.f32 -1.442695, %v1000_v42 }
 0x36e   :  { %2342 = vpow2.f32 %v1921_v43 }
 0x379   :  { %v2341_v44 = vpop.eup %2340 }
 0x37a   :  { %v1004_v45 = vadd.f32 1.0, %v2341_v44 }
 0x37b   :  { %v2343_v50 = vpop.eup %2342 }
 0x37c   :  { %2344 = vrcp.f32 %v1004_v45  ;;  %v1010_v34 = vadd.f32 1.0, %v2343_v50 }
 0x37e   :  { %2346 = vrcp.f32 %v1010_v34 }
 0x389   :  { %v2345_v56 = vpop.eup %2344 }
 0x38a   :  { %v1017_v58 = vmul.f32 %v2345_v56, %v1015_v55 }
 0x38b   :  { %v2347_v60 = vpop.eup %2346 }
 0x38c   :  { %v1018_v54 = vadd.f32 %v1017_v58, %v3001_v48  ;;  %v1020_v39 = vsub.f32 1.0, %v2347_v60  ;;  %v1025_v0 = vmul.f32 %v2347_v60, %v1023_v36 }
 0x38e   :  { %2348 = vtanh.f32 %v1018_v54 }
 0x39b   :  { %v2349_v52 = vpop.eup %2348 }
 0x39c   :  { %v1021_v63 = vmul.f32 %v2349_v52, %v1020_v39 }
 0x39e   :  { %v3052_v1 = vadd.f32 %v1025_v0, %v1021_v63 }
 0x3a0   :  { %1027 = vst [vmem:[#allocation3] sm:$0x4] %v3052_v1  ;;  %v1028_v62 = vpack.c.bf16 %v3052_v1, %v3052_v1 }
 0x3a2   :  { %v1030_v4 = vrot.slane %v1028_v62, 1 }
 0x3a4   :  { %1065 = vmatmul.mubr.bf16.vlgmr.msra.gmra.mxu0 %v1030_v4  ;;  %2133 = vmatmul.mubr.bf16.vlgmr.msra.gmra.mxu1 %v1030_v4  ;;  %v1145_v4 = vrot.slane %v3052_v1, 7 }
 0x3a5   :  { %1157 = vmatpush1.bf16.msra.mxu0 %v2795_v11  ;;  %2137 = vmatpush3.bf16.msra.mxu1 %v2801_v15 }
 0x3a6   :  { %1158 = vmatprep.subr.bf16.mxu0 %v2797_v12  ;;  %2138 = vmatprep.subr.bf16.mxu1 %v2628_v2 }
 0x3a7   :  { %1188 = vmatprep.mubr.bf16.mxu0 %v2629_v3  ;;  %2152 = vmatprep.mubr.msk.bf16.mxu1 %vm2630_vm0, %v2628_v2 }
 0x3a9   :  { %1159 = vmatpush1.bf16.msra.mxu0 %v2799_v14  ;;  %2139 = vmatpush3.bf16.msra.mxu1 %v2808_v17 }
 0x3aa   :  { %1160 = vmatprep.subr.bf16.mxu0 %v2803_v16  ;;  %2140 = vmatprep.subr.bf16.mxu1 %v2628_v2 }
 0x3ad   :  { %1161 = vmatpush1.bf16.msra.mxu0 %v2811_v18  ;;  %2141 = vmatpush3.bf16.msra.mxu1 %v2822_v20 }
 0x3ae   :  { %1162 = vmatprep.subr.bf16.mxu0 %v2816_v19  ;;  %2142 = vmatprep.subr.bf16.mxu1 %v2628_v2 }
 0x3b1   :  { %1163 = vmatpush1.bf16.msra.mxu0 %v2826_v21  ;;  %2143 = vmatpush3.bf16.msra.mxu1 %v2832_v23 }
 0x3b2   :  { %1164 = vmatprep.subr.bf16.mxu0 %v2829_v22  ;;  %2144 = vmatprep.subr.bf16.mxu1 %v2628_v2 }
 0x3b5   :  { %1165 = vmatpush1.bf16.msra.mxu0 %v2836_v24  ;;  %2145 = vmatpush3.bf16.msra.mxu1 %v2842_v26 }
 0x3b6   :  { %1166 = vmatprep.subr.bf16.mxu0 %v2839_v25  ;;  %2146 = vmatprep.subr.bf16.mxu1 %v2628_v2 }
 0x3b9   :  { %1167 = vmatpush1.bf16.msra.mxu0 %v2846_v27  ;;  %2147 = vmatpush3.bf16.msra.mxu1 %v2852_v29 }
 0x3ba   :  { %1168 = vmatprep.subr.bf16.mxu0 %v2849_v28  ;;  %2148 = vmatprep.subr.bf16.mxu1 %v2628_v2 }
 0x3bd   :  { %1169 = vmatpush1.bf16.msra.mxu0 %v2856_v30  ;;  %2149 = vmatpush3.bf16.msra.mxu1 %v2862_v32 }
 0x3be   :  { %1170 = vmatprep.subr.bf16.mxu0 %v2859_v31  ;;  %2150 = vmatprep.subr.bf16.mxu1 %v2628_v2 }
 0x3c1   :  { %1171 = vmatpush1.bf16.msra.mxu0 %v2866_v33  ;;  %2151 = vmatpush3.bf16.msra.mxu1 %v2872_v35 }
 0x3c2   :  { %1278 = vmatprep.subr.bf16.mxu0 %v2782_v57  ;;  %2156 = vmatprep.subr.bf16.mxu1 %v2628_v2 }
 0x464   :  { %v1066_v61 = vpop.f32.mrf.mxu0  ;;  %v1107_v5 = vpop.f32.mrf.mxu1 }
 0x465   :  { %v1115_v6 = vrot.slane %v1066_v61, 5  ;;  %v1135_v54 = vadd.f32 %v1107_v5, %v2942_v8 }
 0x466   :  { %v1068_v7 = vpop.f32.mrf.mxu0  ;;  %v2134_v9 = vpop.f32.mrf.mxu1 }
 0x467   :  { %v1119_v10 = vadd.f32 %v1115_v6, %v2916_v37  ;;  %v1116_v13 = vrot.slane %v1068_v7, 5  ;;  %v1137_v39 = vrot.slane %v1135_v54, 5 }
 0x468   :  { %v1070_v40 = vpop.f32.mrf.mxu0  ;;  %v1110_v41 = vpop.f32.mrf.mxu1 }
 0x469   :  { %v1121_v42 = vadd.f32 %v1119_v10, %v2931_v49  ;;  %v1120_v50 = vadd.f32 %v1116_v13, %v2918_v38 }
 0x46a   :  { %v1071_v43 = vpop.f32.mrf.mxu0  ;;  %v2135_v44 = vpop.f32.mrf.mxu1 }
 0x46b   :  { %v1922_v45 = vmul.f32 -1.442695, %v1121_v42  ;;  %v1122_v53 = vadd.f32 %v1120_v50, %v2938_v59 }
 0x46d   :  { %2350 = vpow2.f32 %v1922_v45  ;;  %v1923_v34 = vmul.f32 -1.442695, %v1122_v53 }
 0x46f   :  { %2352 = vpow2.f32 %v1923_v34 }
 0x47a   :  { %v2351_v55 = vpop.eup %2350 }
 0x47b   :  { %v1126_v56 = vadd.f32 1.0, %v2351_v55 }
 0x47c   :  { %v2353_v58 = vpop.eup %2352 }
 0x47d   :  { %2354 = vrcp.f32 %v1126_v56  ;;  %v1132_v60 = vadd.f32 1.0, %v2353_v58 }
 0x47f   :  { %2356 = vrcp.f32 %v1132_v60 }
 0x48a   :  { %v2355_v36 = vpop.eup %2354 }
 0x48b   :  { %v1139_v52 = vmul.f32 %v2355_v36, %v1137_v39 }
 0x48c   :  { %v2357_v0 = vpop.eup %2356 }
 0x48d   :  { %v1140_v63 = vadd.f32 %v1139_v52, %v3001_v48  ;;  %v1142_v62 = vsub.f32 1.0, %v2357_v0  ;;  %v1147_v7 = vmul.f32 %v2357_v0, %v1145_v4 }
 0x48f   :  { %2358 = vtanh.f32 %v1140_v63 }
 0x49c   :  { %v2359_v61 = vpop.eup %2358 }
 0x49d   :  { %v1143_v6 = vmul.f32 %v2359_v61, %v1142_v62 }
 0x49f   :  { %v3099_v9 = vadd.f32 %v1147_v7, %v1143_v6 }
 0x4a1   :  { %1149 = vst [vmem:[#allocation3] sm:$0x8] %v3099_v9  ;;  %v1150_v5 = vpack.c.bf16 %v3099_v9, %v3099_v9 }
 0x4a3   :  { %v1152_v10 = vshrl.u32 %v1150_v5, 16 }
 0x4a5   :  { %v1154_v13 = vrot.slane %v1152_v10, 1  ;;  %v1269_v10 = vrot.slane %v3099_v9, 7 }
 0x4a7   :  { %1189 = vmatmul.mubr.bf16.vlgmr.msra.gmra.mxu0 %v1154_v13  ;;  %2153 = vmatmul.mubr.bf16.vlgmr.msra.gmra.mxu1 %v1154_v13 }
 0x4a8   :  { %1279 = vmatpush1.bf16.msra.mxu0 %v2795_v11  ;;  %2157 = vmatpush3.bf16.msra.mxu1 %v2801_v15 }
 0x4a9   :  { %1280 = vmatprep.subr.bf16.mxu0 %v2797_v12  ;;  %2158 = vmatprep.subr.bf16.mxu1 %v2628_v2 }
 0x4aa   :  { %1310 = vmatprep.mubr.bf16.mxu0 %v2629_v3  ;;  %2172 = vmatprep.mubr.msk.bf16.mxu1 %vm2630_vm0, %v2628_v2 }
 0x4ac   :  { %1281 = vmatpush1.bf16.msra.mxu0 %v2799_v14  ;;  %2159 = vmatpush3.bf16.msra.mxu1 %v2808_v17 }
 0x4ad   :  { %1282 = vmatprep.subr.bf16.mxu0 %v2803_v16  ;;  %2160 = vmatprep.subr.bf16.mxu1 %v2628_v2 }
 0x4b0   :  { %1283 = vmatpush1.bf16.msra.mxu0 %v2811_v18  ;;  %2161 = vmatpush3.bf16.msra.mxu1 %v2822_v20 }
 0x4b1   :  { %1284 = vmatprep.subr.bf16.mxu0 %v2816_v19  ;;  %2162 = vmatprep.subr.bf16.mxu1 %v2628_v2 }
 0x4b4   :  { %1285 = vmatpush1.bf16.msra.mxu0 %v2826_v21  ;;  %2163 = vmatpush3.bf16.msra.mxu1 %v2832_v23 }
 0x4b5   :  { %1286 = vmatprep.subr.bf16.mxu0 %v2829_v22  ;;  %2164 = vmatprep.subr.bf16.mxu1 %v2628_v2 }
 0x4b8   :  { %1287 = vmatpush1.bf16.msra.mxu0 %v2836_v24  ;;  %2165 = vmatpush3.bf16.msra.mxu1 %v2842_v26 }
 0x4b9   :  { %1288 = vmatprep.subr.bf16.mxu0 %v2839_v25  ;;  %2166 = vmatprep.subr.bf16.mxu1 %v2628_v2 }
 0x4bc   :  { %1289 = vmatpush1.bf16.msra.mxu0 %v2846_v27  ;;  %2167 = vmatpush3.bf16.msra.mxu1 %v2852_v29 }
 0x4bd   :  { %1290 = vmatprep.subr.bf16.mxu0 %v2849_v28  ;;  %2168 = vmatprep.subr.bf16.mxu1 %v2628_v2 }
 0x4c0   :  { %1291 = vmatpush1.bf16.msra.mxu0 %v2856_v30  ;;  %2169 = vmatpush3.bf16.msra.mxu1 %v2862_v32 }
 0x4c1   :  { %1292 = vmatprep.subr.bf16.mxu0 %v2859_v31  ;;  %2170 = vmatprep.subr.bf16.mxu1 %v2628_v2 }
 0x4c4   :  { %1293 = vmatpush1.bf16.msra.mxu0 %v2866_v33  ;;  %2171 = vmatpush3.bf16.msra.mxu1 %v2872_v35 }
 0x4c5   :  { %1402 = vmatprep.subr.bf16.mxu0 %v2782_v57  ;;  %2176 = vmatprep.subr.bf16.mxu1 %v2628_v2 }
 0x567   :  { %v1190_v1 = vpop.f32.mrf.mxu0  ;;  %v1231_v40 = vpop.f32.mrf.mxu1 }
 0x568   :  { %v1239_v41 = vrot.slane %v1190_v1, 4  ;;  %v1259_v63 = vadd.f32 %v1231_v40, %v2942_v8 }
 0x569   :  { %v1192_v42 = vpop.f32.mrf.mxu0  ;;  %v2154_v43 = vpop.f32.mrf.mxu1 }
 0x56a   :  { %v1243_v44 = vadd.f32 %v1239_v41, %v2916_v37  ;;  %v1240_v45 = vrot.slane %v1192_v42, 4  ;;  %v1261_v62 = vrot.slane %v1259_v63, 4  ;;  %v2409_v63 = vld [vmem:[#allocation12 + $0x94] ss:$12 sps:$4 sm:$0xff]  }
 0x56b   :  { %v1194_v50 = vpop.f32.mrf.mxu0  ;;  %v1234_v53 = vpop.f32.mrf.mxu1 }
 0x56c   :  { %v1245_v34 = vadd.f32 %v1243_v44, %v2931_v49  ;;  %v1244_v54 = vadd.f32 %v1240_v45, %v2918_v38 }
 0x56d   :  { %v1195_v55 = vpop.f32.mrf.mxu0  ;;  %v2155_v56 = vpop.f32.mrf.mxu1 }
 0x56e   :  { %v1924_v58 = vmul.f32 -1.442695, %v1245_v34  ;;  %v1246_v57 = vadd.f32 %v1244_v54, %v2938_v59 }
 0x570   :  { %2360 = vpow2.f32 %v1924_v58  ;;  %v1925_v60 = vmul.f32 -1.442695, %v1246_v57 }
 0x572   :  { %2362 = vpow2.f32 %v1925_v60 }
 0x57d   :  { %v2361_v39 = vpop.eup %2360 }
 0x57e   :  { %v1250_v36 = vadd.f32 1.0, %v2361_v39 }
 0x57f   :  { %v2363_v52 = vpop.eup %2362 }
 0x580   :  { %2364 = vrcp.f32 %v1250_v36  ;;  %v1256_v0 = vadd.f32 1.0, %v2363_v52  ;;  %v2407_v36 = vld [vmem:[#allocation12 + $0xa8] ss:$12 sps:$4 sm:$0xff]   ;;  %v2408_v52 = vld [vmem:[#allocation12 + $0xb0] ss:$12 sps:$4 sm:$0xff]  }
 0x582   :  { %2366 = vrcp.f32 %v1256_v0  ;;  %v2410_v0 = vld [vmem:[#allocation12 + $0x90] ss:$12 sps:$4 sm:$0xff]  }
 0x58d   :  { %v2365_v4 = vpop.eup %2364 }
 0x58e   :  { %v1263_v61 = vmul.f32 %v2365_v4, %v1261_v62  ;;  %v2411_v62 = vld [vmem:[#allocation12 + $0x98] ss:$12 sps:$4 sm:$0xff]   ;;  %v2412_v4 = vld [vmem:[#allocation12 + $0x7c] ss:$12 sps:$4 sm:$0xff]  }
 0x58f   :  { %v2367_v7 = vpop.eup %2366 }
 0x590   :  { %v1264_v6 = vadd.f32 %v1263_v61, %v3001_v48  ;;  %v1266_v5 = vsub.f32 1.0, %v2367_v7  ;;  %v1271_v41 = vmul.f32 %v2367_v7, %v1269_v10  ;;  %v2413_v61 = vld [vmem:[#allocation12 + $0x78] ss:$12 sps:$4 sm:$0xff]   ;;  %v2417_v10 = vld [vmem:[#allocation12 + $0x68] ss:$12 sps:$4 sm:$0xff]  }
 0x591   :  { %v2415_v7 = vld [vmem:[#allocation12 + $0x64] ss:$12 sps:$4 sm:$0xff]  }
 0x592   :  { %2368 = vtanh.f32 %v1264_v6  ;;  %v2414_v6 = vld [vmem:[#allocation12 + $0x80] ss:$12 sps:$4 sm:$0xff]  }
 0x59f   :  { %v2369_v13 = vpop.eup %2368 }
 0x5a0   :  { %v1267_v1 = vmul.f32 %v2369_v13, %v1266_v5  ;;  %v2416_v5 = vld [vmem:[#allocation12 + $0x60] ss:$12 sps:$4 sm:$0xff]  }
 0x5a1   :  { %v2418_v13 = vld [vmem:[#allocation12 + $0x4c] ss:$12 sps:$4 sm:$0xff]  }
 0x5a2   :  { %v3146_v42 = vadd.f32 %v1271_v41, %v1267_v1  ;;  %v2419_v1 = vld [vmem:[#allocation12 + $0x48] ss:$12 sps:$4 sm:$0xff]   ;;  %v2420_v41 = vld [vmem:[#allocation12 + $0x50] ss:$12 sps:$4 sm:$0xff]  }
 0x5a4   :  { %1273 = vst [vmem:[#allocation3] sm:$0x10] %v3146_v42  ;;  %v1274_v40 = vpack.c.bf16 %v3146_v42, %v3146_v42  ;;  %v1391_v34 = vrot.slane %v3146_v42, 7  ;;  %v2421_v42 = vld [vmem:[#allocation12 + $0x34] ss:$12 sps:$4 sm:$0xff]  }
 0x5a6   :  { %v1276_v43 = vrot.slane %v1274_v40, 2  ;;  %v2422_v40 = vld [vmem:[#allocation12 + $0x30] ss:$12 sps:$4 sm:$0xff]  }
 0x5a8   :  { %1311 = vmatmul.mubr.bf16.vlgmr.msra.gmra.mxu0 %v1276_v43  ;;  %2173 = vmatmul.mubr.bf16.vlgmr.msra.gmra.mxu1 %v1276_v43  ;;  %v2423_v43 = vld [vmem:[#allocation12 + $0x38] ss:$12 sps:$4 sm:$0xff]  }
 0x5a9   :  { %1403 = vmatpush1.bf16.msra.mxu0 %v2795_v11  ;;  %2177 = vmatpush3.bf16.msra.mxu1 %v2801_v15  ;;  %v2406_v11 = vld [vmem:[#allocation12 + $0xac] ss:$12 sps:$4 sm:$0xff]  }
 0x5aa   :  { %1404 = vmatprep.subr.bf16.mxu0 %v2797_v12  ;;  %2178 = vmatprep.subr.bf16.mxu1 %v2628_v2 }
 0x5ab   :  { %1434 = vmatprep.mubr.bf16.mxu0 %v2629_v3  ;;  %2192 = vmatprep.mubr.msk.bf16.mxu1 %vm2630_vm0, %v2628_v2 }
 0x5ad   :  { %1405 = vmatpush1.bf16.msra.mxu0 %v2799_v14  ;;  %2179 = vmatpush3.bf16.msra.mxu1 %v2808_v17 }
 0x5ae   :  { %1406 = vmatprep.subr.bf16.mxu0 %v2803_v16  ;;  %2180 = vmatprep.subr.bf16.mxu1 %v2628_v2 }
 0x5b1   :  { %1407 = vmatpush1.bf16.msra.mxu0 %v2811_v18  ;;  %2181 = vmatpush3.bf16.msra.mxu1 %v2822_v20 }
 0x5b2   :  { %1408 = vmatprep.subr.bf16.mxu0 %v2816_v19  ;;  %2182 = vmatprep.subr.bf16.mxu1 %v2628_v2 }
 0x5b5   :  { %1409 = vmatpush1.bf16.msra.mxu0 %v2826_v21  ;;  %2183 = vmatpush3.bf16.msra.mxu1 %v2832_v23 }
 0x5b6   :  { %1410 = vmatprep.subr.bf16.mxu0 %v2829_v22  ;;  %2184 = vmatprep.subr.bf16.mxu1 %v2628_v2 }
 0x5b9   :  { %1411 = vmatpush1.bf16.msra.mxu0 %v2836_v24  ;;  %2185 = vmatpush3.bf16.msra.mxu1 %v2842_v26 }
 0x5ba   :  { %1412 = vmatprep.subr.bf16.mxu0 %v2839_v25  ;;  %2186 = vmatprep.subr.bf16.mxu1 %v2628_v2 }
 0x5bd   :  { %1413 = vmatpush1.bf16.msra.mxu0 %v2846_v27  ;;  %2187 = vmatpush3.bf16.msra.mxu1 %v2852_v29 }
 0x5be   :  { %1414 = vmatprep.subr.bf16.mxu0 %v2849_v28  ;;  %2188 = vmatprep.subr.bf16.mxu1 %v2628_v2 }
 0x5c1   :  { %1415 = vmatpush1.bf16.msra.mxu0 %v2856_v30  ;;  %2189 = vmatpush3.bf16.msra.mxu1 %v2862_v32 }
 0x5c2   :  { %1416 = vmatprep.subr.bf16.mxu0 %v2859_v31  ;;  %2190 = vmatprep.subr.bf16.mxu1 %v2628_v2 }
 0x5c5   :  { %1417 = vmatpush1.bf16.msra.mxu0 %v2866_v33  ;;  %2191 = vmatpush3.bf16.msra.mxu1 %v2872_v35 }
 0x5c6   :  { %1524 = vmatprep.subr.bf16.mxu0 %v2406_v11  ;;  %2196 = vmatprep.subr.bf16.mxu1 %v2628_v2  ;;  %v2424_v11 = vld [vmem:[#allocation12 + $0x1c] ss:$12 sps:$4 sm:$0xff]  }
 0x668   :  { %v1312_v12 = vpop.f32.mrf.mxu0  ;;  %v1353_v14 = vpop.f32.mrf.mxu1 }
 0x669   :  { %v1361_v15 = vrot.slane %v1312_v12, 3  ;;  %v1381_v32 = vadd.f32 %v1353_v14, %v2942_v8  ;;  %v2425_v12 = vld [vmem:[#allocation12 + $0x18] ss:$12 sps:$4 sm:$0xff]   ;;  %v2426_v14 = vld [vmem:[#allocation12 + $0x20] ss:$12 sps:$4 sm:$0xff]  }
 0x66a   :  { %v1314_v16 = vpop.f32.mrf.mxu0  ;;  %v2174_v17 = vpop.f32.mrf.mxu1 }
 0x66b   :  { %v1365_v18 = vadd.f32 %v1361_v15, %v2916_v37  ;;  %v1362_v19 = vrot.slane %v1314_v16, 3  ;;  %v1383_v35 = vrot.slane %v1381_v32, 3  ;;  %v2427_v15 = vld [vmem:[#allocation12 + $0x4] ss:$12 sps:$4 sm:$0xff]   ;;  %v2428_v16 = vld [vmem:[#allocation12] ss:$12 sps:$4 sm:$0xff]  }
 0x66c   :  { %v1316_v20 = vpop.f32.mrf.mxu0  ;;  %v1356_v21 = vpop.f32.mrf.mxu1  ;;  %v2429_v17 = vld [vmem:[#allocation12 + $0x8] ss:$12 sps:$4 sm:$0xff]  }
 0x66d   :  { %v1367_v22 = vadd.f32 %v1365_v18, %v2931_v49  ;;  %v1366_v26 = vadd.f32 %v1362_v19, %v2918_v38 }
 0x66e   :  { %v1317_v23 = vpop.f32.mrf.mxu0  ;;  %v2175_v24 = vpop.f32.mrf.mxu1 }
 0x66f   :  { %v1926_v25 = vmul.f32 -1.442695, %v1367_v22  ;;  %v1368_v27 = vadd.f32 %v1366_v26, %v2938_v59 }
 0x671   :  { %2370 = vpow2.f32 %v1926_v25  ;;  %v1927_v28 = vmul.f32 -1.442695, %v1368_v27 }
 0x673   :  { %2372 = vpow2.f32 %v1927_v28 }
 0x67e   :  { %v2371_v29 = vpop.eup %2370 }
 0x67f   :  { %v1372_v30 = vadd.f32 1.0, %v2371_v29 }
 0x680   :  { %v2373_v31 = vpop.eup %2372 }
 0x681   :  { %2374 = vrcp.f32 %v1372_v30  ;;  %v1378_v33 = vadd.f32 1.0, %v2373_v31 }
 0x683   :  { %2376 = vrcp.f32 %v1378_v33 }
 0x68e   :  { %v2375_v9 = vpop.eup %2374 }
 0x68f   :  { %v1385_v44 = vmul.f32 %v2375_v9, %v1383_v35 }
 0x690   :  { %v2377_v50 = vpop.eup %2376 }
 0x691   :  { %v1386_v45 = vadd.f32 %v1385_v44, %v3001_v48  ;;  %v1388_v53 = vsub.f32 1.0, %v2377_v50  ;;  %v1393_v58 = vmul.f32 %v2377_v50, %v1391_v34 }
 0x693   :  { %2378 = vtanh.f32 %v1386_v45 }
 0x6a0   :  { %v2379_v55 = vpop.eup %2378 }
 0x6a1   :  { %v1389_v56 = vmul.f32 %v2379_v55, %v1388_v53 }
 0x6a3   :  { %v3192_v54 = vadd.f32 %v1393_v58, %v1389_v56 }
 0x6a5   :  { %1395 = vst [vmem:[#allocation3] sm:$0x20] %v3192_v54  ;;  %v1396_v57 = vpack.c.bf16 %v3192_v54, %v3192_v54 }
 0x6a7   :  { %v1398_v60 = vshrl.u32 %v1396_v57, 16  ;;  %v1515_v57 = vrot.slane %v3192_v54, 7  ;;  %v2301_v54 = vld [vmem:[#allocation15 + $0x64] ss:$8 sps:$4 sm:$0xff]  }
 0x6a9   :  { %v1400_v39 = vrot.slane %v1398_v60, 2 }
 0x6ab   :  { %1435 = vmatmul.mubr.bf16.vlgmr.msra.gmra.mxu0 %v1400_v39  ;;  %2193 = vmatmul.mubr.bf16.vlgmr.msra.gmra.mxu1 %v1400_v39 }
 0x6ac   :  { %1525 = vmatpush1.bf16.msra.mxu0 %v2407_v36  ;;  %2197 = vmatpush3.bf16.msra.mxu1 %v2408_v52 }
 0x6ad   :  { %1526 = vmatprep.subr.bf16.mxu0 %v2409_v63  ;;  %2198 = vmatprep.subr.bf16.mxu1 %v2628_v2 }
 0x6ae   :  { %1556 = vmatprep.mubr.bf16.mxu0 %v2629_v3  ;;  %2212 = vmatprep.mubr.msk.bf16.mxu1 %vm2630_vm0, %v2628_v2 }
 0x6b0   :  { %1527 = vmatpush1.bf16.msra.mxu0 %v2410_v0  ;;  %2199 = vmatpush3.bf16.msra.mxu1 %v2411_v62  ;;  %v2298_v0 = vld [vmem:[#allocation15 + $0x74] ss:$8 sps:$4 sm:$0xff]   ;;  %v2296_v62 = vld [vmem:[#allocation15 + $0x70] ss:$8 sps:$4 sm:$0xff]  }
 0x6b1   :  { %1528 = vmatprep.subr.bf16.mxu0 %v2412_v4  ;;  %2200 = vmatprep.subr.bf16.mxu1 %v2628_v2  ;;  %v2299_v4 = vld [vmem:[#allocation15 + $0x60] ss:$8 sps:$4 sm:$0xff]  }
 0x6b4   :  { %1529 = vmatpush1.bf16.msra.mxu0 %v2413_v61  ;;  %2201 = vmatpush3.bf16.msra.mxu1 %v2414_v6  ;;  %v2304_v61 = vld [vmem:[#allocation15 + $0x54] ss:$8 sps:$4 sm:$0xff]   ;;  %v2302_v6 = vld [vmem:[#allocation15 + $0x50] ss:$8 sps:$4 sm:$0xff]  }
 0x6b5   :  { %1530 = vmatprep.subr.bf16.mxu0 %v2415_v7  ;;  %2202 = vmatprep.subr.bf16.mxu1 %v2628_v2  ;;  %v2307_v7 = vld [vmem:[#allocation15 + $0x44] ss:$8 sps:$4 sm:$0xff]  }
 0x6b8   :  { %1531 = vmatpush1.bf16.msra.mxu0 %v2416_v5  ;;  %2203 = vmatpush3.bf16.msra.mxu1 %v2417_v10  ;;  %v2305_v5 = vld [vmem:[#allocation15 + $0x40] ss:$8 sps:$4 sm:$0xff]   ;;  %v2310_v10 = vld [vmem:[#allocation15 + $0x34] ss:$8 sps:$4 sm:$0xff]  }
 0x6b9   :  { %1532 = vmatprep.subr.bf16.mxu0 %v2418_v13  ;;  %2204 = vmatprep.subr.bf16.mxu1 %v2628_v2  ;;  %v2308_v13 = vld [vmem:[#allocation15 + $0x30] ss:$8 sps:$4 sm:$0xff]  }
 0x6bc   :  { %1533 = vmatpush1.bf16.msra.mxu0 %v2419_v1  ;;  %2205 = vmatpush3.bf16.msra.mxu1 %v2420_v41  ;;  %v2311_v1 = vld [vmem:[#allocation15 + $0x20] ss:$8 sps:$4 sm:$0xff]   ;;  %v2314_v41 = vld [vmem:[#allocation15 + $0x10] ss:$8 sps:$4 sm:$0xff]  }
 0x6bd   :  { %1534 = vmatprep.subr.bf16.mxu0 %v2421_v42  ;;  %2206 = vmatprep.subr.bf16.mxu1 %v2628_v2  ;;  %v2316_v42 = vld [vmem:[#allocation15 + $0x14] ss:$8 sps:$4 sm:$0xff]  }
 0x6c0   :  { %1535 = vmatpush1.bf16.msra.mxu0 %v2422_v40  ;;  %2207 = vmatpush3.bf16.msra.mxu1 %v2423_v43  ;;  %v2319_v40 = vld [vmem:[#allocation15 + $0x4] ss:$8 sps:$4 sm:$0xff]   ;;  %v2317_v43 = vld [vmem:[#allocation15] ss:$8 sps:$4 sm:$0xff]  }
 0x6c1   :  { %1536 = vmatprep.subr.bf16.mxu0 %v2424_v11  ;;  %2208 = vmatprep.subr.bf16.mxu1 %v2628_v2 }
 0x6c4   :  { %1537 = vmatpush1.bf16.msra.mxu0 %v2425_v12  ;;  %2209 = vmatpush3.bf16.msra.mxu1 %v2426_v14 }
 0x6c5   :  { %1538 = vmatprep.subr.bf16.mxu0 %v2427_v15  ;;  %2210 = vmatprep.subr.bf16.mxu1 %v2628_v2 }
 0x6c8   :  { %1539 = vmatpush1.bf16.msra.mxu0 %v2428_v16  ;;  %2211 = vmatpush3.bf16.msra.mxu1 %v2429_v17 }
 0x6c9   :  { %1753 = vmatprep.subr.bf16.mxu0 %v2298_v0 }
 0x76b   :  { %v1436_v18 = vpop.f32.mrf.mxu0  ;;  %v1477_v19 = vpop.f32.mrf.mxu1 }
 0x76c   :  { %v1485_v20 = vrot.slane %v1436_v18, 2  ;;  %v1505_v44 = vadd.f32 %v1477_v19, %v2942_v8 }
 0x76d   :  { %v1438_v21 = vpop.f32.mrf.mxu0  ;;  %v2194_v22 = vpop.f32.mrf.mxu1 }
 0x76e   :  { %v1489_v23 = vadd.f32 %v1485_v20, %v2916_v37  ;;  %v1486_v24 = vrot.slane %v1438_v21, 2  ;;  %v1507_v50 = vrot.slane %v1505_v44, 2 }
 0x76f   :  { %v1440_v25 = vpop.f32.mrf.mxu0  ;;  %v1480_v26 = vpop.f32.mrf.mxu1 }
 0x770   :  { %v1491_v27 = vadd.f32 %v1489_v23, %v2931_v49  ;;  %v1490_v2 = vadd.f32 %v1486_v24, %v2918_v38 }
 0x771   :  { %v1441_v28 = vpop.f32.mrf.mxu0  ;;  %v2195_v29 = vpop.f32.mrf.mxu1 }
 0x772   :  { %v1928_v30 = vmul.f32 -1.442695, %v1491_v27  ;;  %v1492_v31 = vadd.f32 %v1490_v2, %v2938_v59 }
 0x774   :  { %2380 = vpow2.f32 %v1928_v30  ;;  %v1929_v32 = vmul.f32 -1.442695, %v1492_v31 }
 0x776   :  { %2382 = vpow2.f32 %v1929_v32 }
 0x781   :  { %v2381_v33 = vpop.eup %2380 }
 0x782   :  { %v1496_v35 = vadd.f32 1.0, %v2381_v33 }
 0x783   :  { %v2383_v9 = vpop.eup %2382 }
 0x784   :  { %2384 = vrcp.f32 %v1496_v35  ;;  %v1502_v45 = vadd.f32 1.0, %v2383_v9 }
 0x786   :  { %2386 = vrcp.f32 %v1502_v45 }
 0x791   :  { %v2385_v53 = vpop.eup %2384 }
 0x792   :  { %v1509_v34 = vmul.f32 %v2385_v53, %v1507_v50 }
 0x793   :  { %v2387_v56 = vpop.eup %2386 }
 0x794   :  { %v1510_v55 = vadd.f32 %v1509_v34, %v3001_v48  ;;  %v1512_v58 = vsub.f32 1.0, %v2387_v56  ;;  %v1517_v36 = vmul.f32 %v2387_v56, %v1515_v57  ;;  %v1661_v56 = vld [vmem:[%s3247_s9] sm:$0x3]  ;;  %s2631_s9 = smov [#allocation18]  }
 0x795   :  { %s1829_s2 = sshll.u32 %s2631_s9, 4  ;;  %s1830_s2 = int_to_ptr.vmem [resolvable:$true] %s1829_s2 }
 0x796   :  { %2388 = vtanh.f32 %v1510_v55  ;;  %s2563_s12 = scalar_lea.vmem %s1830_s2, 16  ;;  %s2567_s13 = scalar_lea.vmem %s1830_s2, 32 }
 0x797   :  { %p2564_p7 = scmp.ne.s32.totalorder %s1830_s2, %s2563_s12  ;;  %p2568_p8 = scmp.lt.s32.totalorder %s1830_s2, %s1830_s2 }
 0x798   :  { %p2569_p9 = scmp.lt.s32.totalorder %s2567_s13, %s2563_s12 }
 0x79a   :  { %p2570_p10 = por %p2569_p9, %p2568_p8 }
 0x79c   :  { %p2571_p11 = pnand %p2570_p10, %p2564_p7 }
 0x7a3   :  { %v2389_v60 = vpop.eup %2388 }
 0x7a4   :  { %v1513_v39 = vmul.f32 %v2389_v60, %v1512_v58  ;;  %v1670_v58 = vrot.slane %v1661_v56, %v751_v51 }
 0x7a6   :  { %v3214_v52 = vadd.f32 %v1517_v36, %v1513_v39 }
 0x7a8   :  { %1519 = vst [vmem:[#allocation3] sm:$0x40] %v3214_v52  ;;  %v1520_v8 = vpack.c.bf16 %v3214_v52, %v3214_v52  ;;  %v1637_v9 = vrot.slane %v3214_v52, 7 }
 0x7aa   :  { %v1522_v63 = vrot.slane %v1520_v8, 3 }
 0x7ac   :  { %1557 = vmatmul.mubr.bf16.vlgmr.msra.gmra.mxu0 %v1522_v63  ;;  %2213 = vmatmul.mubr.bf16.vlgmr.msra.gmra.mxu1 %v1522_v63 }
 0x7ad   :  { %1785 = vmatprep.mubr.bf16.mxu0 %v2629_v3  ;;  %1754 = vmatpush1.bf16.msra.mxu0 %v2296_v62  ;;  %v2313_v3 = vld [vmem:[#allocation15 + $0x24] ss:$8 sps:$4 sm:$0xff]  }
 0x7ae   :  { %1755 = vmatprep.subr.bf16.mxu0 %v2301_v54 }
 0x7b1   :  { %1756 = vmatpush1.bf16.msra.mxu0 %v2299_v4 }
 0x7b2   :  { %1757 = vmatprep.subr.bf16.mxu0 %v2304_v61 }
 0x7b5   :  { %1758 = vmatpush1.bf16.msra.mxu0 %v2302_v6 }
 0x7b6   :  { %1759 = vmatprep.subr.bf16.mxu0 %v2307_v7 }
 0x7b9   :  { %1760 = vmatpush1.bf16.msra.mxu0 %v2305_v5 }
 0x7ba   :  { %1761 = vmatprep.subr.bf16.mxu0 %v2310_v10 }
 0x7bd   :  { %1762 = vmatpush1.bf16.msra.mxu0 %v2308_v13 }
 0x7be   :  { %1763 = vmatprep.subr.bf16.mxu0 %v2313_v3 }
 0x7c1   :  { %1764 = vmatpush1.bf16.msra.mxu0 %v2311_v1 }
 0x7c2   :  { %1765 = vmatprep.subr.bf16.mxu0 %v2316_v42 }
 0x7c5   :  { %1766 = vmatpush1.bf16.msra.mxu0 %v2314_v41 }
 0x7c6   :  { %1767 = vmatprep.subr.bf16.mxu0 %v2319_v40 }
 0x7c9   :  { %1768 = vmatpush1.bf16.msra.mxu0 %v2317_v43 }
 0x86c   :  { %v1558_v11 = vpop.f32.mrf.mxu0  ;;  %v1599_v12 = vpop.f32.mrf.mxu1 }
 0x86d   :  { %v1607_v14 = vrot.slane %v1558_v11, 1 }
 0x86e   :  { %v1560_v15 = vpop.f32.mrf.mxu0  ;;  %v2214_v16 = vpop.f32.mrf.mxu1 }
 0x86f   :  { %v1611_v17 = vadd.f32 %v1607_v14, %v2916_v37  ;;  %v1608_v18 = vrot.slane %v1560_v15, 1  ;;  %v2430_v37 = vld [vmem:[#allocation14] sm:$0x1] }
 0x870   :  { %v1562_v19 = vpop.f32.mrf.mxu0  ;;  %v1602_v20 = vpop.f32.mrf.mxu1  ;;  %v1627_v2 = vadd.f32 %v2430_v37, %v1599_v12 }
 0x871   :  { %v1613_v21 = vadd.f32 %v1611_v17, %v2931_v49  ;;  %v1612_v25 = vadd.f32 %v1608_v18, %v2918_v38 }
 0x872   :  { %v1563_v22 = vpop.f32.mrf.mxu0  ;;  %v2215_v23 = vpop.f32.mrf.mxu1  ;;  %v1629_v32 = vrot.slane %v1627_v2, 1 }
 0x873   :  { %v1930_v24 = vmul.f32 -1.442695, %v1613_v21  ;;  %v1614_v26 = vadd.f32 %v1612_v25, %v2938_v59 }
 0x875   :  { %2390 = vpow2.f32 %v1930_v24  ;;  %v1931_v27 = vmul.f32 -1.442695, %v1614_v26 }
 0x877   :  { %2392 = vpow2.f32 %v1931_v27 }
 0x882   :  { %v2391_v28 = vpop.eup %2390 }
 0x883   :  { %v1618_v29 = vadd.f32 1.0, %v2391_v28 }
 0x884   :  { %v2393_v30 = vpop.eup %2392 }
 0x885   :  { %2394 = vrcp.f32 %v1618_v29  ;;  %v1624_v31 = vadd.f32 1.0, %v2393_v30 }
 0x887   :  { %2396 = vrcp.f32 %v1624_v31 }
 0x892   :  { %v2395_v33 = vpop.eup %2394 }
 0x893   :  { %v1631_v49 = vmul.f32 %v2395_v33, %v1629_v32 }
 0x894   :  { %v2397_v38 = vpop.eup %2396 }
 0x895   :  { %v1632_v35 = vadd.f32 %v1631_v49, %v3001_v48  ;;  %v1634_v59 = vsub.f32 1.0, %v2397_v38  ;;  %v1639_v50 = vmul.f32 %v2397_v38, %v1637_v9  ;;  %v1666_v48 = vrot.slane %v1661_v56, %v2925_v47 }
 0x897   :  { %2398 = vtanh.f32 %v1632_v35 }
 0x8a4   :  { %v2399_v44 = vpop.eup %2398 }
 0x8a5   :  { %v1635_v45 = vmul.f32 %v2399_v44, %v1634_v59 }
 0x8a7   :  { %v1640_v53 = vadd.f32 %v1639_v50, %v1635_v45 }
 0x8a9   :  { %1641 = vst [vmem:[#allocation3] sm:$0x80] %v1640_v53  ;;  %1642 = vst [vmem:[#allocation18 - $0x7] sm:$0x80] %v1640_v53 }
 0x8b0   :  { %v1643_v34 = vld [vmem:[#allocation3] sm:$0xff] }
 0x8b1   :  { %v1644_v55 = vpack.c.bf16 %v1643_v34, %v1643_v34 }
 0x8b3   :  { %1786 = vmatmul.mubr.bf16.vlgmr.msra.gmra.mxu0 %v1644_v55 }
 0x973   :  { %v1787_v57 = vpop.f32.mrf.mxu0 }
 0x974   :  { %v1788_v39 = vadd.f32 %v1787_v57, %v1666_v48 }
 0x975   :  { %v1789_v60 = vpop.f32.mrf.mxu0 }
 0x976   :  { %v1790_v36 = vadd.f32 %v1789_v60, %v1670_v58 }
 0x977   :  { %v1791_v52 = vpop.f32.mrf.mxu0 }
 0x978   :  { %v1794_v8 = vmax.f32 %v1788_v39, %v1790_v36 }
 0x979   :  { %v1792_v63 = vpop.f32.mrf.mxu0 }
 0x97a   :  { %1795 = vmax.xlane.f32.xlu0 %v1794_v8 }
 0xa03   :  { %v1796_v0 = vpop.xlane.xlu0 %1795 }
 0xa04   :  { %v1797_v62 = vsub.f32 %v1788_v39, %v1796_v0  ;;  %v1798_v54 = vsub.f32 %v1790_v36, %v1796_v0 }
 0xa06   :  { %v1799_v4 = vmul.f32 1.442695, %v1797_v62  ;;  %v1801_v61 = vmul.f32 1.442695, %v1798_v54 }
 0xa08   :  { %2400 = vpow2.f32 %v1799_v4 }
 0xa09   :  { %2402 = vpow2.f32 %v1801_v61 }
 0xa15   :  { %v2401_v6 = vpop.eup %2400 }
 0xa16   :  { %v2403_v47 = vpop.eup %2402 }
 0xa17   :  { %v1803_v7 = vadd.f32 %v2403_v47, %v2401_v6 }
 0xa19   :  { %1804 = vadd.xlane.f32.xlu0 %v1803_v7 }
 0xa1a   :  { %2574 = shalt.err (!%p2571_p11)
}
 0xa1b   :  { %1832 = dma.vmem_to_hbm [thread:$0]  %s1830_s2, 16, %s3249_s11, [#allocation19]  }
 0xa1c   :  { %s2632_s29 = smov [#allocation17]  }
 0xa1d   :  { %s1819_s7 = sshll.u32 %s2632_s29, 4  ;;  %s1820_s7 = int_to_ptr.vmem [resolvable:$true] %s1819_s7 }
 0xa1e   :  { %s2583_s8 = scalar_lea.vmem %s1820_s7, 256  ;;  %p2588_p13 = scmp.lt.s32.totalorder %s1820_s7, %s1820_s7 }
 0xa1f   :  { %p2584_p12 = scmp.ne.s32.totalorder %s1820_s7, %s2583_s8  ;;  %p2589_p0 = scmp.lt.s32.totalorder %s2583_s8, %s2583_s8 }
 0xa21   :  { %p2590_p1 = por %p2589_p0, %p2588_p13 }
 0xa23   :  { %p2591_p2 = pnand %p2590_p1, %p2584_p12 }
 0xaa2   :  { %v1805_v46 = vpop.xlane.xlu0 %1804 }
 0xaa3   :  { %2404 = vlog2.f32 %v1805_v46 }
 0xab0   :  { %v2405_v51 = vpop.eup %2404 }
 0xab1   :  { %v1807_v5 = vmul.f32 0.6931472, %v2405_v51 }
 0xab3   :  { %v1808_v10 = vadd.f32 %v1807_v5, %v1796_v0 }
 0xab5   :  { %v1809_v13 = vsub.f32 %v1788_v39, %v1808_v10  ;;  %v1810_v3 = vsub.f32 %v1790_v36, %v1808_v10 }
 0xab7   :  { %1811 = vst [vmem:[#allocation17] sm:$0xff] %v1809_v13  ;;  %1812 = vst [vmem:[#allocation17 + $0x8] sm:$0xff] %v1810_v3 }
 0xab8   :  { %2594 = shalt.err (!%p2591_p2)
}
 0xab9   :  { %1822 = dma.vmem_to_hbm [thread:$0]  %s1820_s7, 256, %s3248_s10, [#allocation6]  }
 0xaba   :  { %2613 = dma.done.wait [#allocation6], 256  }
 0xabb   :  { %2614 = vsyncadd [#allocation6], 4294967040 }
 0xabc   :  { %2615 = dma.done.wait [#allocation19], 16  }
 0xabd   :  { %2616 = vsyncadd [#allocation19], 4294967280 }
 0xabe   :  { %1839 = vsyncpa [#allocation5], 1 }
 0xabf   :  { %1840 = vsyncpa [#allocation10], 1 }
 0xac0   :  { %1841 = vsyncpa [#allocation13], 1 }
 0xac1   :  { %1842 = vsyncpa [#allocation16], 1 }
 0xac2   :  { %1843 = vsyncpa [#allocation6], 1 }
 0xac3   :  { %1844 = vsyncpa [#allocation19], 1 }
 0xac4   :  { %1845 = vsyncpa [#allocation7], 1 }

</bundles_post_ra>
